<compile_context>
chip_gen: v7x
topology: tpu7x:2x2x1
jax: 0.10.0
libtpu: 0.0.40
codegen_flags: <defaults>
</compile_context>

<pallas_src>
import functools

import jax
import jax.numpy as jnp
from jax import lax
from jax.experimental import pallas as pl
from jax.experimental.pallas import tpu as pltpu


def _tpu_generation():
    """Best-effort TPU generation (4/5/6/7) from device_kind; defaults to 6."""
    try:
        kind = jax.devices()[0].device_kind.lower()
    except Exception:
        return 6
    for g in (7, 6, 5, 4):
        if f"v{g}" in kind or f"tpu{g}" in kind:
            return g
    return 6


def _probe_copy_kernel(x_ref, o_ref):
    o_ref[...] = x_ref[...]


@functools.lru_cache(maxsize=1)
def _single_buffering_supported():
    """Probe whether pipeline_mode=pl.Buffered(1) is accepted by this build."""
    try:
        spec = pl.BlockSpec((8, 128), lambda i: (0, 0), pipeline_mode=pl.Buffered(1))
        fn = pl.pallas_call(
            _probe_copy_kernel,
            out_shape=jax.ShapeDtypeStruct((8, 128), jnp.float32),
            grid=(1,),
            in_specs=[spec],
            out_specs=pl.BlockSpec((8, 128), lambda i: (0, 0)),
        )
        jax.block_until_ready(fn(jnp.zeros((8, 128), jnp.float32)))
        return True
    except Exception:
        return False


def _mha_kernel(head_size, att_size, scale,
                q_ref, k_ref, v_ref, bias_ref,
                wq_ref, bq_ref, wk_ref, bk_ref, wv_ref, bv_ref,
                wo_ref, bo_ref,
                o_ref,
                k_scratch, v_scratch, ctx_scratch):
    qi = pl.program_id(1)

    # ---- K / V projections: once per batch element, resident across q tiles.
    @pl.when(qi == 0)
    def _():
        k_in = k_ref[0].astype(jnp.bfloat16)                         # (S, hidden)
        v_in = v_ref[0].astype(jnp.bfloat16)
        Kp = jnp.dot(k_in, wk_ref[...],
                     preferred_element_type=jnp.float32) + bk_ref[...]
        Vp = jnp.dot(v_in, wv_ref[...],
                     preferred_element_type=jnp.float32) + bv_ref[...]
        k_scratch[...] = Kp.astype(jnp.bfloat16)
        v_scratch[...] = Vp.astype(jnp.bfloat16)

    # ---- Q projection for this query tile (softmax scale folded in once).
    q_in = q_ref[0].astype(jnp.bfloat16)                             # (TQ, hidden)
    Q = jnp.dot(q_in, wq_ref[...],
                preferred_element_type=jnp.float32) + bq_ref[...]
    Q = (Q * scale).astype(jnp.bfloat16)                             # (TQ, hidden)

    # ---- Per-head attention. K/V/bias per head come straight off refs
    # (zero-cost slices); contexts land in a bf16 VMEM scratch so the output
    # projection is one K=hidden MXU matmul with no concatenate/relayout.
    # TODO(synk): if att_size < 128 at real shapes, switch the K/V scratch to a
    # head-major (H, S, d) (or d padded to 128) layout for unmasked lane tiles.
    for h in range(head_size):                 # head_size is small and static
        lo = h * att_size
        hi = lo + att_size
        Qh = Q[:, lo:hi]                                             # (TQ, d) bf16
        Kh = k_scratch[:, lo:hi]                                     # (S,  d) bf16 (ref slice)
        Vh = v_scratch[:, lo:hi]                                     # (S,  d) bf16 (ref slice)

        # scores = Qh @ Kh^T without materializing a transpose.
        scores = lax.dot_general(
            Qh, Kh, dimension_numbers=(((1,), (1,)), ((), ())),
            preferred_element_type=jnp.float32)                      # (TQ, S) f32
        scores = scores + bias_ref[0, h].astype(jnp.float32)         # bias streamed bf16

        m = jnp.max(scores, axis=-1, keepdims=True)
        e = jnp.exp(scores - m)
        p = e * pl.reciprocal(jnp.sum(e, axis=-1, keepdims=True), approx=True)
        # TODO(synk): attention dropout omitted (identity at eval / rate 0.0).

        ctx_scratch[:, lo:hi] = jnp.dot(
            p.astype(jnp.bfloat16), Vh,
            preferred_element_type=jnp.float32).astype(jnp.bfloat16)

    out = jnp.dot(ctx_scratch[...], wo_ref[...],
                  preferred_element_type=jnp.float32) + bo_ref[...]
    o_ref[0] = out.astype(o_ref.dtype)


def _build_call(B, S, hidden, head_size, att_size, scale, q_tile, out_dtype,
                single_buffer, gen):
    nq = S // q_tile
    kernel = functools.partial(_mha_kernel, head_size, att_size, scale)

    # Blocks that are never re-fetched (weights/biases) or only re-fetched per
    # batch element (k, v) don't need double buffering; reclaiming that VMEM is
    # what lets larger q tiles fit under v7x's 64 MiB / TC.
    pm = {"pipeline_mode": pl.Buffered(1)} if single_buffer else {}

    def const_spec(shape):
        return pl.BlockSpec(shape, lambda b, qi: (0, 0), **pm)

    n_buf = 1 if single_buffer else 2
    est = (
        2 * q_tile * hidden * 4                       # q tile (f32, double-buffered)
        + n_buf * 2 * S * hidden * 4                  # raw k / v blocks (f32)
        + 2 * head_size * q_tile * S * 2              # attn_bias tile (bf16, x2)
        + 2 * q_tile * hidden * 4                     # output tile (f32, x2)
        + n_buf * 4 * (hidden * hidden + hidden) * 2  # bf16 weights (+ biases)
        + 2 * S * hidden * 2                          # projected K / V bf16 scratch
        + q_tile * hidden * 2                         # per-tile context scratch
        + 8 * q_tile * S * 4                          # scores / softmax temporaries
    )
    # v7x has 64 MiB VMEM per TensorCore -> leave headroom; v5e/v6e have 128 MiB.
    cap = (52 * 2**20) if gen >= 7 else (100 * 2**20)
    vmem_limit = int(min(cap, max(8 * 2**20, 2 * est)))

    return pl.pallas_call(
        kernel,
        out_shape=jax.ShapeDtypeStruct((B, S, hidden), out_dtype),
        grid_spec=pltpu.PrefetchScalarGridSpec(
            num_scalar_prefetch=0,
            grid=(B, nq),
            in_specs=[
                pl.BlockSpec((1, q_tile, hidden), lambda b, qi: (b, qi, 0)),    # q
                pl.BlockSpec((1, S, hidden), lambda b, qi: (b, 0, 0), **pm),    # k
                pl.BlockSpec((1, S, hidden), lambda b, qi: (b, 0, 0), **pm),    # v
                pl.BlockSpec((1, head_size, q_tile, S),
                             lambda b, qi: (b, 0, qi, 0)),                      # attn_bias (bf16)
                const_spec((hidden, hidden)), const_spec((1, hidden)),          # wq, bq
                const_spec((hidden, hidden)), const_spec((1, hidden)),          # wk, bk
                const_spec((hidden, hidden)), const_spec((1, hidden)),          # wv, bv
                const_spec((hidden, hidden)), const_spec((1, hidden)),          # wo, bo
            ],
            out_specs=pl.BlockSpec((1, q_tile, hidden), lambda b, qi: (b, qi, 0)),
            scratch_shapes=[
                pltpu.VMEM((S, hidden), jnp.bfloat16),        # projected K
                pltpu.VMEM((S, hidden), jnp.bfloat16),        # projected V
                pltpu.VMEM((q_tile, hidden), jnp.bfloat16),   # per-tile context
            ],
        ),
        compiler_params=pltpu.CompilerParams(
            # Batch tiles are independent (megacore-shardable); the query-tile
            # axis carries the resident K/V scratch so it stays sequential.
            dimension_semantics=("parallel", "arbitrary"),
            vmem_limit_bytes=vmem_limit,
        ),
    )


def mha_forward(q, k, v, attn_bias, params, *, head_size, q_tile=None):
    B, S, hidden = q.shape
    assert hidden % head_size == 0, "hidden_size must be divisible by head_size"
    att_size = hidden // head_size
    scale = att_size ** (-0.5)
    gen = _tpu_generation()

    # Query-tile size: 256 matches the 256-wide MXU on v6e/v7x; 128 on v5e;
    # whole-S fallback for tiny demo shapes.
    if q_tile is None:
        q_tile = S
        if S % 128 == 0:
            q_tile = 128
            if gen >= 6 and S % 256 == 0:
                bias_tile_bytes = 2 * head_size * 256 * S * 2   # bf16, double-buffered
                if gen < 7 or bias_tile_bytes <= 24 * 2**20:
                    q_tile = 256
    assert S % q_tile == 0, "seq length must be divisible by q_tile"

    wq, bq, wk, bk, wv, bv, wo, bo = params
    # Weights only feed the MXU -> bf16 (halves weight VMEM/DMA); biases and
    # all softmax math stay f32.
    wq, wk, wv, wo = (w.astype(jnp.bfloat16) for w in (wq, wk, wv, wo))
    bq, bk, bv, bo = (b.reshape(1, hidden).astype(jnp.float32)
                      for b in (bq, bk, bv, bo))
    # attn_bias is the dominant HBM stream (B*H*S^2 elements): stream it bf16
    # and add to the f32 scores inside the kernel.
    bias_bf16 = attn_bias.astype(jnp.bfloat16)
    # TODO(synk): accept q/k/v (and emit the output) in bf16 when the upstream
    # producer already emits bf16 activations (do NOT add a wrapper-side cast).
    # TODO(synk): on v7x, hoist the K/V projection into its own small kernel and
    # stream bf16 Kp/Vp so both grid axes become "parallel" and the resident
    # (S, hidden) scratch buffers disappear.

    call = _build_call(B, S, hidden, head_size, att_size, scale, q_tile,
                       q.dtype, _single_buffering_supported(), gen)
    return call(q, k, v, bias_bf16, wq, bq, wk, bk, wv, bv, wo, bo)


def _reference(q, k, v, attn_bias, params, *, head_size):
    """Pure-JAX (f32) reference mirroring the PyTorch forward."""
    wq, bq, wk, bk, wv, bv, wo, bo = params
    B, S, hidden = q.shape
    d = hidden // head_size
    scale = d ** (-0.5)
    Q = (q @ wq + bq).reshape(B, S, head_size, d).transpose(0, 2, 1, 3)
    K = (k @ wk + bk).reshape(B, S, head_size, d).transpose(0, 2, 1, 3)
    V = (v @ wv + bv).reshape(B, S, head_size, d).transpose(0, 2, 1, 3)
    x = jnp.einsum("bhqd,bhkd->bhqk", Q * scale, K) + attn_bias
    x = jax.nn.softmax(x, axis=-1)
    x = jnp.einsum("bhqk,bhkd->bhqd", x, V)
    x = x.transpose(0, 2, 1, 3).reshape(B, S, hidden)
    return x @ wo + bo


if __name__ == "__main__":
    B, S, hidden, head_size = 2, 8, 32, 4
    key = jax.random.PRNGKey(0)
    ks = jax.random.split(key, 12)

    def init_w(kk, shape):
        return jax.random.normal(kk, shape, jnp.float32) * 0.05

    # Weights stored as (in, out); biases as (1, out).
    wq = init_w(ks[0], (hidden, hidden)); bq = init_w(ks[1], (1, hidden))
    wk = init_w(ks[2], (hidden, hidden)); bk = init_w(ks[3], (1, hidden))
    wv = init_w(ks[4], (hidden, hidden)); bv = init_w(ks[5], (1, hidden))
    wo = init_w(ks[6], (hidden, hidden)); bo = init_w(ks[7], (1, hidden))
    params = (wq, bq, wk, bk, wv, bv, wo, bo)

    q = jax.random.normal(ks[8], (B, S, hidden), jnp.float32)
    k = jax.random.normal(ks[9], (B, S, hidden), jnp.float32)
    v = jax.random.normal(ks[10], (B, S, hidden), jnp.float32)
    attn_bias = jax.random.normal(ks[11], (B, head_size, S, S), jnp.float32) * 0.1

    out = mha_forward(q, k, v, attn_bias, params, head_size=head_size)
    out = jax.block_until_ready(out)

    ref = _reference(q, k, v, attn_bias, params, head_size=head_size)
    assert out.shape == (B, S, hidden)
    # bf16 MXU operands / bf16 bias stream (f32 accumulation) + approx softmax
    # reciprocal => relaxed tolerance versus the pure-f32 reference.
    assert jnp.allclose(out, ref, atol=2e-2, rtol=2e-2), "mismatch vs reference"
    print("KERNEL_OK")
</pallas_src>

<mosaic_0001>
module attributes {stable_mosaic.version = 11 : i64} {
  func.func @_probe_copy_kernel(%arg0: i32, %arg1: memref<8x128xf32, #tpu.memory_space<vmem>>, %arg2: memref<8x128xf32, #tpu.memory_space<vmem>>) attributes {dimension_semantics = [#tpu.dimension_semantics<arbitrary>], iteration_bounds = array<i64: 1>, scalar_prefetch = 0 : i64, scratch_operands = 0 : i64, tpu.core_type = #tpu.core_type<tc>, window_params = [{pipeline_mode = #tpu.pipeline_mode<synchronous>, transform_indices = @transform_0, window_bounds = array<i64: 8, 128>}, {pipeline_mode = #tpu.pipeline_mode<synchronous>, transform_indices = @transform_1, window_bounds = array<i64: 8, 128>}]} {
    %c0 = arith.constant 0 : index
    %c0_0 = arith.constant 0 : index
    %0 = vector.load %arg1[%c0, %c0_0] : memref<8x128xf32, #tpu.memory_space<vmem>>, vector<8x128xf32>
    %c0_1 = arith.constant 0 : index
    %c0_2 = arith.constant 0 : index
    %1 = vector.load %arg2[%c0_1, %c0_2] : memref<8x128xf32, #tpu.memory_space<vmem>>, vector<8x128xf32>
    tpu.vector_store %arg2[%c0_1, %c0_2], %0 {strides = array<i32>} : memref<8x128xf32, #tpu.memory_space<vmem>>, vector<8x128xf32>,
    return
  }
  func.func @transform_0(%arg0: i32) -> (i32, i32) {
    %c0_i32 = arith.constant 0 : i32
    %c0_i32_0 = arith.constant 0 : i32
    %c0_i32_1 = arith.constant 0 : i32
    return %c0_i32, %c0_i32_0 : i32, i32
  }
  func.func @transform_1(%arg0: i32) -> (i32, i32) {
    %c0_i32 = arith.constant 0 : i32
    %c0_i32_0 = arith.constant 0 : i32
    %c0_i32_1 = arith.constant 0 : i32
    return %c0_i32, %c0_i32_0 : i32, i32
  }
}

module attributes {stable_mosaic.version = 11 : i64} {
  func.func @_mha_kernel(%arg0: i32, %arg1: i32, %arg2: memref<1x8x32xf32, #tpu.memory_space<vmem>>, %arg3: memref<1x8x32xf32, #tpu.memory_space<vmem>>, %arg4: memref<1x8x32xf32, #tpu.memory_space<vmem>>, %arg5: memref<1x4x8x8xbf16, #tpu.memory_space<vmem>>, %arg6: memref<32x32xbf16, #tpu.memory_space<vmem>>, %arg7: memref<1x32xf32, #tpu.memory_space<vmem>>, %arg8: memref<32x32xbf16, #tpu.memory_space<vmem>>, %arg9: memref<1x32xf32, #tpu.memory_space<vmem>>, %arg10: memref<32x32xbf16, #tpu.memory_space<vmem>>, %arg11: memref<1x32xf32, #tpu.memory_space<vmem>>, %arg12: memref<32x32xbf16, #tpu.memory_space<vmem>>, %arg13: memref<1x32xf32, #tpu.memory_space<vmem>>, %arg14: memref<1x8x32xf32, #tpu.memory_space<vmem>>, %arg15: memref<8x32xbf16, #tpu.memory_space<vmem>>, %arg16: memref<8x32xbf16, #tpu.memory_space<vmem>>, %arg17: memref<8x32xbf16, #tpu.memory_space<vmem>>) attributes {dimension_semantics = [#tpu.dimension_semantics<parallel>, #tpu.dimension_semantics<arbitrary>], iteration_bounds = array<i64: 2, 1>, scalar_prefetch = 0 : i64, scratch_operands = 3 : i64, tpu.core_type = #tpu.core_type<tc>, window_params = [{transform_indices = @transform_0, window_bounds = array<i64: 1, 8, 32>}, {transform_indices = @transform_1, window_bounds = array<i64: 1, 8, 32>}, {transform_indices = @transform_2, window_bounds = array<i64: 1, 8, 32>}, {transform_indices = @transform_3, window_bounds = array<i64: 1, 4, 8, 8>}, {pipeline_mode = #tpu.pipeline_mode<synchronous>, transform_indices = @transform_4, window_bounds = array<i64: 32, 32>}, {pipeline_mode = #tpu.pipeline_mode<synchronous>, transform_indices = @transform_5, window_bounds = array<i64: 1, 32>}, {pipeline_mode = #tpu.pipeline_mode<synchronous>, transform_indices = @transform_6, window_bounds = array<i64: 32, 32>}, {pipeline_mode = #tpu.pipeline_mode<synchronous>, transform_indices = @transform_7, window_bounds = array<i64: 1, 32>}, {pipeline_mode = #tpu.pipeline_mode<synchronous>, transform_indices = @transform_8, window_bounds = array<i64: 32, 32>}, {pipeline_mode = #tpu.pipeline_mode<synchronous>, transform_indices = @transform_9, window_bounds = array<i64: 1, 32>}, {pipeline_mode = #tpu.pipeline_mode<synchronous>, transform_indices = @transform_10, window_bounds = array<i64: 32, 32>}, {pipeline_mode = #tpu.pipeline_mode<synchronous>, transform_indices = @transform_11, window_bounds = array<i64: 1, 32>}, {transform_indices = @transform_12, window_bounds = array<i64: 1, 8, 32>}]} {
    %c0_i32 = arith.constant 0 : i32
    %0 = arith.cmpi eq, %arg1, %c0_i32 : i32
    %1 = arith.extui %0 : i1 to i32
    %c0_i32_0 = arith.constant 0 : i32
    %2 = arith.cmpi ne, %1, %c0_i32_0 : i32
    scf.if %2 {
      %c0_68 = arith.constant 0 : index
      %c0_69 = arith.constant 0 : index
      %c0_70 = arith.constant 0 : index
      %111 = vector.load %arg3[%c0_68, %c0_69, %c0_70] : memref<1x8x32xf32, #tpu.memory_space<vmem>>, vector<1x8x32xf32>
      %112 = vector.shape_cast %111 : vector<1x8x32xf32> to vector<8x32xf32>
      %113 = arith.truncf %112 : vector<8x32xf32> to vector<8x32xbf16>
      %c0_71 = arith.constant 0 : index
      %c0_72 = arith.constant 0 : index
      %c0_73 = arith.constant 0 : index
      %114 = vector.load %arg4[%c0_71, %c0_72, %c0_73] : memref<1x8x32xf32, #tpu.memory_space<vmem>>, vector<1x8x32xf32>
      %115 = vector.shape_cast %114 : vector<1x8x32xf32> to vector<8x32xf32>
      %116 = arith.truncf %115 : vector<8x32xf32> to vector<8x32xbf16>
      %c0_74 = arith.constant 0 : index
      %c0_75 = arith.constant 0 : index
      %117 = vector.load %arg8[%c0_74, %c0_75] : memref<32x32xbf16, #tpu.memory_space<vmem>>, vector<32x32xbf16>
      %cst_76 = arith.constant dense<0.000000e+00> : vector<8x32xf32>
      %118 = tpu.matmul %113, %117, %cst_76 {dimension_numbers = #tpu.dot_dimension_numbers<[1], [0], [0], [1], [0, 0, 1, 1], [], []>} : vector<8x32xbf16>, vector<32x32xbf16>, vector<8x32xf32> -> vector<8x32xf32>
      %c0_77 = arith.constant 0 : index
      %c0_78 = arith.constant 0 : index
      %119 = vector.load %arg9[%c0_77, %c0_78] : memref<1x32xf32, #tpu.memory_space<vmem>>, vector<1x32xf32>
      %120 = vector.broadcast %119 : vector<1x32xf32> to vector<8x32xf32>
      %121 = arith.addf %118, %120 : vector<8x32xf32>
      %c0_79 = arith.constant 0 : index
      %c0_80 = arith.constant 0 : index
      %122 = vector.load %arg10[%c0_79, %c0_80] : memref<32x32xbf16, #tpu.memory_space<vmem>>, vector<32x32xbf16>
      %cst_81 = arith.constant dense<0.000000e+00> : vector<8x32xf32>
      %123 = tpu.matmul %116, %122, %cst_81 {dimension_numbers = #tpu.dot_dimension_numbers<[1], [0], [0], [1], [0, 0, 1, 1], [], []>} : vector<8x32xbf16>, vector<32x32xbf16>, vector<8x32xf32> -> vector<8x32xf32>
      %c0_82 = arith.constant 0 : index
      %c0_83 = arith.constant 0 : index
      %124 = vector.load %arg11[%c0_82, %c0_83] : memref<1x32xf32, #tpu.memory_space<vmem>>, vector<1x32xf32>
      %125 = vector.broadcast %124 : vector<1x32xf32> to vector<8x32xf32>
      %126 = arith.addf %123, %125 : vector<8x32xf32>
      %127 = arith.truncf %121 : vector<8x32xf32> to vector<8x32xbf16>
      %c0_84 = arith.constant 0 : index
      %c0_85 = arith.constant 0 : index
      %128 = vector.load %arg15[%c0_84, %c0_85] : memref<8x32xbf16, #tpu.memory_space<vmem>>, vector<8x32xbf16>
      tpu.vector_store %arg15[%c0_84, %c0_85], %127 {strides = array<i32>} : memref<8x32xbf16, #tpu.memory_space<vmem>>, vector<8x32xbf16>,
      %129 = arith.truncf %126 : vector<8x32xf32> to vector<8x32xbf16>
      %c0_86 = arith.constant 0 : index
      %c0_87 = arith.constant 0 : index
      %130 = vector.load %arg16[%c0_86, %c0_87] : memref<8x32xbf16, #tpu.memory_space<vmem>>, vector<8x32xbf16>
      tpu.vector_store %arg16[%c0_86, %c0_87], %129 {strides = array<i32>} : memref<8x32xbf16, #tpu.memory_space<vmem>>, vector<8x32xbf16>,
    } else {
    }
    %c0 = arith.constant 0 : index
    %c0_1 = arith.constant 0 : index
    %c0_2 = arith.constant 0 : index
    %3 = vector.load %arg2[%c0, %c0_1, %c0_2] : memref<1x8x32xf32, #tpu.memory_space<vmem>>, vector<1x8x32xf32>
    %4 = vector.shape_cast %3 : vector<1x8x32xf32> to vector<8x32xf32>
    %5 = arith.truncf %4 : vector<8x32xf32> to vector<8x32xbf16>
    %c0_3 = arith.constant 0 : index
    %c0_4 = arith.constant 0 : index
    %6 = vector.load %arg6[%c0_3, %c0_4] : memref<32x32xbf16, #tpu.memory_space<vmem>>, vector<32x32xbf16>
    %cst = arith.constant dense<0.000000e+00> : vector<8x32xf32>
    %7 = tpu.matmul %5, %6, %cst {dimension_numbers = #tpu.dot_dimension_numbers<[1], [0], [0], [1], [0, 0, 1, 1], [], []>} : vector<8x32xbf16>, vector<32x32xbf16>, vector<8x32xf32> -> vector<8x32xf32>
    %c0_5 = arith.constant 0 : index
    %c0_6 = arith.constant 0 : index
    %8 = vector.load %arg7[%c0_5, %c0_6] : memref<1x32xf32, #tpu.memory_space<vmem>>, vector<1x32xf32>
    %9 = vector.broadcast %8 : vector<1x32xf32> to vector<8x32xf32>
    %10 = arith.addf %7, %9 : vector<8x32xf32>
    %cst_7 = arith.constant 0.353553385 : f32
    %11 = vector.broadcast %cst_7 : f32 to vector<8x32xf32>
    %12 = arith.mulf %10, %11 : vector<8x32xf32>
    %13 = arith.truncf %12 : vector<8x32xf32> to vector<8x32xbf16>
    %14 = vector.extract_strided_slice %13 {offsets = [0, 0], sizes = [8, 8], strides = [1, 1]} : vector<8x32xbf16> to vector<8x8xbf16>
    %c0_8 = arith.constant 0 : index
    %c0_9 = arith.constant 0 : index
    %15 = vector.load %arg15[%c0_8, %c0_9] : memref<8x32xbf16, #tpu.memory_space<vmem>>, vector<8x8xbf16>
    %c0_10 = arith.constant 0 : index
    %c0_11 = arith.constant 0 : index
    %16 = vector.load %arg16[%c0_10, %c0_11] : memref<8x32xbf16, #tpu.memory_space<vmem>>, vector<8x8xbf16>
    %cst_12 = arith.constant dense<0.000000e+00> : vector<8x8xf32>
    %17 = tpu.matmul %14, %15, %cst_12 {dimension_numbers = #tpu.dot_dimension_numbers<[1], [1], [0], [0], [0, 0, 1, 0], [], []>} : vector<8x8xbf16>, vector<8x8xbf16>, vector<8x8xf32> -> vector<8x8xf32>
    %c0_13 = arith.constant 0 : index
    %c0_14 = arith.constant 0 : index
    %c0_15 = arith.constant 0 : index
    %c0_16 = arith.constant 0 : index
    %18 = vector.load %arg5[%c0_13, %c0_14, %c0_15, %c0_16] : memref<1x4x8x8xbf16, #tpu.memory_space<vmem>>, vector<1x1x8x8xbf16>
    %19 = vector.shape_cast %18 : vector<1x1x8x8xbf16> to vector<8x8xbf16>
    %20 = arith.extf %19 : vector<8x8xbf16> to vector<8x8xf32>
    %21 = arith.addf %17, %20 : vector<8x8xf32>
    %cst_17 = arith.constant dense<0xFF800000> : vector<8xf32>
    %22 = vector.multi_reduction <maximumf>, %21, %cst_17 [1] : vector<8x8xf32> to vector<8xf32>
    %23 = vector.shape_cast %22 : vector<8xf32> to vector<8x1xf32>
    %24 = vector.broadcast %23 : vector<8x1xf32> to vector<8x8xf32>
    %25 = arith.subf %21, %24 : vector<8x8xf32>
    %26 = math.exp %25 : vector<8x8xf32>
    %cst_18 = arith.constant dense<0.000000e+00> : vector<8xf32>
    %27 = vector.multi_reduction <add>, %26, %cst_18 [1] : vector<8x8xf32> to vector<8xf32>
    %28 = vector.shape_cast %27 : vector<8xf32> to vector<8x1xf32>
    %29 = tpu.reciprocal %28 {approx = true} : vector<8x1xf32> -> vector<8x1xf32>
    %30 = vector.broadcast %29 : vector<8x1xf32> to vector<8x8xf32>
    %31 = arith.mulf %26, %30 : vector<8x8xf32>
    %32 = arith.truncf %31 : vector<8x8xf32> to vector<8x8xbf16>
    %cst_19 = arith.constant dense<0.000000e+00> : vector<8x8xf32>
    %33 = tpu.matmul %32, %16, %cst_19 {dimension_numbers = #tpu.dot_dimension_numbers<[1], [0], [0], [1], [0, 0, 1, 1], [], []>} : vector<8x8xbf16>, vector<8x8xbf16>, vector<8x8xf32> -> vector<8x8xf32>
    %34 = arith.truncf %33 : vector<8x8xf32> to vector<8x8xbf16>
    %c0_20 = arith.constant 0 : index
    %c0_21 = arith.constant 0 : index
    %35 = vector.load %arg17[%c0_20, %c0_21] : memref<8x32xbf16, #tpu.memory_space<vmem>>, vector<8x8xbf16>
    tpu.vector_store %arg17[%c0_20, %c0_21], %34 {strides = array<i32>} : memref<8x32xbf16, #tpu.memory_space<vmem>>, vector<8x8xbf16>,
    %36 = vector.extract_strided_slice %13 {offsets = [0, 8], sizes = [8, 8], strides = [1, 1]} : vector<8x32xbf16> to vector<8x8xbf16>
    %c0_22 = arith.constant 0 : index
    %c8 = arith.constant 8 : index
    %37 = vector.load %arg15[%c0_22, %c8] : memref<8x32xbf16, #tpu.memory_space<vmem>>, vector<8x8xbf16>
    %c0_23 = arith.constant 0 : index
    %c8_24 = arith.constant 8 : index
    %38 = vector.load %arg16[%c0_23, %c8_24] : memref<8x32xbf16, #tpu.memory_space<vmem>>, vector<8x8xbf16>
    %cst_25 = arith.constant dense<0.000000e+00> : vector<8x8xf32>
    %39 = tpu.matmul %36, %37, %cst_25 {dimension_numbers = #tpu.dot_dimension_numbers<[1], [1], [0], [0], [0, 0, 1, 0], [], []>} : vector<8x8xbf16>, vector<8x8xbf16>, vector<8x8xf32> -> vector<8x8xf32>
    %c0_26 = arith.constant 0 : index
    %c1 = arith.constant 1 : index
    %c0_27 = arith.constant 0 : index
    %c0_28 = arith.constant 0 : index
    %40 = vector.load %arg5[%c0_26, %c1, %c0_27, %c0_28] : memref<1x4x8x8xbf16, #tpu.memory_space<vmem>>, vector<1x1x8x8xbf16>
    %41 = vector.shape_cast %40 : vector<1x1x8x8xbf16> to vector<8x8xbf16>
    %42 = arith.extf %41 : vector<8x8xbf16> to vector<8x8xf32>
    %43 = arith.addf %39, %42 : vector<8x8xf32>
    %cst_29 = arith.constant dense<0xFF800000> : vector<8xf32>
    %44 = vector.multi_reduction <maximumf>, %43, %cst_29 [1] : vector<8x8xf32> to vector<8xf32>
    %45 = vector.shape_cast %44 : vector<8xf32> to vector<8x1xf32>
    %46 = vector.broadcast %45 : vector<8x1xf32> to vector<8x8xf32>
    %47 = arith.subf %43, %46 : vector<8x8xf32>
    %48 = math.exp %47 : vector<8x8xf32>
    %cst_30 = arith.constant dense<0.000000e+00> : vector<8xf32>
    %49 = vector.multi_reduction <add>, %48, %cst_30 [1] : vector<8x8xf32> to vector<8xf32>
    %50 = vector.shape_cast %49 : vector<8xf32> to vector<8x1xf32>
    %51 = tpu.reciprocal %50 {approx = true} : vector<8x1xf32> -> vector<8x1xf32>
    %52 = vector.broadcast %51 : vector<8x1xf32> to vector<8x8xf32>
    %53 = arith.mulf %48, %52 : vector<8x8xf32>
    %54 = arith.truncf %53 : vector<8x8xf32> to vector<8x8xbf16>
    %cst_31 = arith.constant dense<0.000000e+00> : vector<8x8xf32>
    %55 = tpu.matmul %54, %38, %cst_31 {dimension_numbers = #tpu.dot_dimension_numbers<[1], [0], [0], [1], [0, 0, 1, 1], [], []>} : vector<8x8xbf16>, vector<8x8xbf16>, vector<8x8xf32> -> vector<8x8xf32>
    %56 = arith.truncf %55 : vector<8x8xf32> to vector<8x8xbf16>
    %c0_32 = arith.constant 0 : index
    %c8_33 = arith.constant 8 : index
    %57 = vector.load %arg17[%c0_32, %c8_33] : memref<8x32xbf16, #tpu.memory_space<vmem>>, vector<8x8xbf16>
    tpu.vector_store %arg17[%c0_32, %c8_33], %56 {strides = array<i32>} : memref<8x32xbf16, #tpu.memory_space<vmem>>, vector<8x8xbf16>,
    %58 = vector.extract_strided_slice %13 {offsets = [0, 16], sizes = [8, 8], strides = [1, 1]} : vector<8x32xbf16> to vector<8x8xbf16>
    %c0_34 = arith.constant 0 : index
    %c16 = arith.constant 16 : index
    %59 = vector.load %arg15[%c0_34, %c16] : memref<8x32xbf16, #tpu.memory_space<vmem>>, vector<8x8xbf16>
    %c0_35 = arith.constant 0 : index
    %c16_36 = arith.constant 16 : index
    %60 = vector.load %arg16[%c0_35, %c16_36] : memref<8x32xbf16, #tpu.memory_space<vmem>>, vector<8x8xbf16>
    %cst_37 = arith.constant dense<0.000000e+00> : vector<8x8xf32>
    %61 = tpu.matmul %58, %59, %cst_37 {dimension_numbers = #tpu.dot_dimension_numbers<[1], [1], [0], [0], [0, 0, 1, 0], [], []>} : vector<8x8xbf16>, vector<8x8xbf16>, vector<8x8xf32> -> vector<8x8xf32>
    %c0_38 = arith.constant 0 : index
    %c2 = arith.constant 2 : index
    %c0_39 = arith.constant 0 : index
    %c0_40 = arith.constant 0 : index
    %62 = vector.load %arg5[%c0_38, %c2, %c0_39, %c0_40] : memref<1x4x8x8xbf16, #tpu.memory_space<vmem>>, vector<1x1x8x8xbf16>
    %63 = vector.shape_cast %62 : vector<1x1x8x8xbf16> to vector<8x8xbf16>
    %64 = arith.extf %63 : vector<8x8xbf16> to vector<8x8xf32>
    %65 = arith.addf %61, %64 : vector<8x8xf32>
    %cst_41 = arith.constant dense<0xFF800000> : vector<8xf32>
    %66 = vector.multi_reduction <maximumf>, %65, %cst_41 [1] : vector<8x8xf32> to vector<8xf32>
    %67 = vector.shape_cast %66 : vector<8xf32> to vector<8x1xf32>
    %68 = vector.broadcast %67 : vector<8x1xf32> to vector<8x8xf32>
    %69 = arith.subf %65, %68 : vector<8x8xf32>
    %70 = math.exp %69 : vector<8x8xf32>
    %cst_42 = arith.constant dense<0.000000e+00> : vector<8xf32>
    %71 = vector.multi_reduction <add>, %70, %cst_42 [1] : vector<8x8xf32> to vector<8xf32>
    %72 = vector.shape_cast %71 : vector<8xf32> to vector<8x1xf32>
    %73 = tpu.reciprocal %72 {approx = true} : vector<8x1xf32> -> vector<8x1xf32>
    %74 = vector.broadcast %73 : vector<8x1xf32> to vector<8x8xf32>
    %75 = arith.mulf %70, %74 : vector<8x8xf32>
    %76 = arith.truncf %75 : vector<8x8xf32> to vector<8x8xbf16>
    %cst_43 = arith.constant dense<0.000000e+00> : vector<8x8xf32>
    %77 = tpu.matmul %76, %60, %cst_43 {dimension_numbers = #tpu.dot_dimension_numbers<[1], [0], [0], [1], [0, 0, 1, 1], [], []>} : vector<8x8xbf16>, vector<8x8xbf16>, vector<8x8xf32> -> vector<8x8xf32>
    %78 = arith.truncf %77 : vector<8x8xf32> to vector<8x8xbf16>
    %c0_44 = arith.constant 0 : index
    %c16_45 = arith.constant 16 : index
    %79 = vector.load %arg17[%c0_44, %c16_45] : memref<8x32xbf16, #tpu.memory_space<vmem>>, vector<8x8xbf16>
    tpu.vector_store %arg17[%c0_44, %c16_45], %78 {strides = array<i32>} : memref<8x32xbf16, #tpu.memory_space<vmem>>, vector<8x8xbf16>,
    %80 = vector.extract_strided_slice %13 {offsets = [0, 24], sizes = [8, 8], strides = [1, 1]} : vector<8x32xbf16> to vector<8x8xbf16>
    %c0_46 = arith.constant 0 : index
    %c24 = arith.constant 24 : index
    %81 = vector.load %arg15[%c0_46, %c24] : memref<8x32xbf16, #tpu.memory_space<vmem>>, vector<8x8xbf16>
    %c0_47 = arith.constant 0 : index
    %c24_48 = arith.constant 24 : index
    %82 = vector.load %arg16[%c0_47, %c24_48] : memref<8x32xbf16, #tpu.memory_space<vmem>>, vector<8x8xbf16>
    %cst_49 = arith.constant dense<0.000000e+00> : vector<8x8xf32>
    %83 = tpu.matmul %80, %81, %cst_49 {dimension_numbers = #tpu.dot_dimension_numbers<[1], [1], [0], [0], [0, 0, 1, 0], [], []>} : vector<8x8xbf16>, vector<8x8xbf16>, vector<8x8xf32> -> vector<8x8xf32>
    %c0_50 = arith.constant 0 : index
    %c3 = arith.constant 3 : index
    %c0_51 = arith.constant 0 : index
    %c0_52 = arith.constant 0 : index
    %84 = vector.load %arg5[%c0_50, %c3, %c0_51, %c0_52] : memref<1x4x8x8xbf16, #tpu.memory_space<vmem>>, vector<1x1x8x8xbf16>
    %85 = vector.shape_cast %84 : vector<1x1x8x8xbf16> to vector<8x8xbf16>
    %86 = arith.extf %85 : vector<8x8xbf16> to vector<8x8xf32>
    %87 = arith.addf %83, %86 : vector<8x8xf32>
    %cst_53 = arith.constant dense<0xFF800000> : vector<8xf32>
    %88 = vector.multi_reduction <maximumf>, %87, %cst_53 [1] : vector<8x8xf32> to vector<8xf32>
    %89 = vector.shape_cast %88 : vector<8xf32> to vector<8x1xf32>
    %90 = vector.broadcast %89 : vector<8x1xf32> to vector<8x8xf32>
    %91 = arith.subf %87, %90 : vector<8x8xf32>
    %92 = math.exp %91 : vector<8x8xf32>
    %cst_54 = arith.constant dense<0.000000e+00> : vector<8xf32>
    %93 = vector.multi_reduction <add>, %92, %cst_54 [1] : vector<8x8xf32> to vector<8xf32>
    %94 = vector.shape_cast %93 : vector<8xf32> to vector<8x1xf32>
    %95 = tpu.reciprocal %94 {approx = true} : vector<8x1xf32> -> vector<8x1xf32>
    %96 = vector.broadcast %95 : vector<8x1xf32> to vector<8x8xf32>
    %97 = arith.mulf %92, %96 : vector<8x8xf32>
    %98 = arith.truncf %97 : vector<8x8xf32> to vector<8x8xbf16>
    %cst_55 = arith.constant dense<0.000000e+00> : vector<8x8xf32>
    %99 = tpu.matmul %98, %82, %cst_55 {dimension_numbers = #tpu.dot_dimension_numbers<[1], [0], [0], [1], [0, 0, 1, 1], [], []>} : vector<8x8xbf16>, vector<8x8xbf16>, vector<8x8xf32> -> vector<8x8xf32>
    %100 = arith.truncf %99 : vector<8x8xf32> to vector<8x8xbf16>
    %c0_56 = arith.constant 0 : index
    %c24_57 = arith.constant 24 : index
    %101 = vector.load %arg17[%c0_56, %c24_57] : memref<8x32xbf16, #tpu.memory_space<vmem>>, vector<8x8xbf16>
    tpu.vector_store %arg17[%c0_56, %c24_57], %100 {strides = array<i32>} : memref<8x32xbf16, #tpu.memory_space<vmem>>, vector<8x8xbf16>,
    %c0_58 = arith.constant 0 : index
    %c0_59 = arith.constant 0 : index
    %102 = vector.load %arg17[%c0_58, %c0_59] : memref<8x32xbf16, #tpu.memory_space<vmem>>, vector<8x32xbf16>
    %c0_60 = arith.constant 0 : index
    %c0_61 = arith.constant 0 : index
    %103 = vector.load %arg12[%c0_60, %c0_61] : memref<32x32xbf16, #tpu.memory_space<vmem>>, vector<32x32xbf16>
    %cst_62 = arith.constant dense<0.000000e+00> : vector<8x32xf32>
    %104 = tpu.matmul %102, %103, %cst_62 {dimension_numbers = #tpu.dot_dimension_numbers<[1], [0], [0], [1], [0, 0, 1, 1], [], []>} : vector<8x32xbf16>, vector<32x32xbf16>, vector<8x32xf32> -> vector<8x32xf32>
    %c0_63 = arith.constant 0 : index
    %c0_64 = arith.constant 0 : index
    %105 = vector.load %arg13[%c0_63, %c0_64] : memref<1x32xf32, #tpu.memory_space<vmem>>, vector<1x32xf32>
    %106 = vector.broadcast %105 : vector<1x32xf32> to vector<8x32xf32>
    %107 = arith.addf %104, %106 : vector<8x32xf32>
    %c0_65 = arith.constant 0 : index
    %c0_66 = arith.constant 0 : index
    %c0_67 = arith.constant 0 : index
    %108 = vector.load %arg14[%c0_65, %c0_66, %c0_67] : memref<1x8x32xf32, #tpu.memory_space<vmem>>, vector<1x8x32xf32>
    %109 = vector.shape_cast %108 : vector<1x8x32xf32> to vector<8x32xf32>
    %110 = vector.shape_cast %107 : vector<8x32xf32> to vector<1x8x32xf32>
    tpu.vector_store %arg14[%c0_65, %c0_66, %c0_67], %110 {strides = array<i32>} : memref<1x8x32xf32, #tpu.memory_space<vmem>>, vector<1x8x32xf32>,
    return
  }
  func.func @transform_0(%arg0: i32, %arg1: i32) -> (i32, i32, i32) {
    %c0_i32 = arith.constant 0 : i32
    %c0_i32_0 = arith.constant 0 : i32
    return %arg0, %arg1, %c0_i32 : i32, i32, i32
  }
  func.func @transform_1(%arg0: i32, %arg1: i32) -> (i32, i32, i32) {
    %c0_i32 = arith.constant 0 : i32
    %c0_i32_0 = arith.constant 0 : i32
    %c0_i32_1 = arith.constant 0 : i32
    return %arg0, %c0_i32, %c0_i32_0 : i32, i32, i32
  }
  func.func @transform_2(%arg0: i32, %arg1: i32) -> (i32, i32, i32) {
    %c0_i32 = arith.constant 0 : i32
    %c0_i32_0 = arith.constant 0 : i32
    %c0_i32_1 = arith.constant 0 : i32
    return %arg0, %c0_i32, %c0_i32_0 : i32, i32, i32
  }
  func.func @transform_3(%arg0: i32, %arg1: i32) -> (i32, i32, i32, i32) {
    %c0_i32 = arith.constant 0 : i32
    %c0_i32_0 = arith.constant 0 : i32
    %c0_i32_1 = arith.constant 0 : i32
    return %arg0, %c0_i32, %arg1, %c0_i32_0 : i32, i32, i32, i32
  }
  func.func @transform_4(%arg0: i32, %arg1: i32) -> (i32, i32) {
    %c0_i32 = arith.constant 0 : i32
    %c0_i32_0 = arith.constant 0 : i32
    %c0_i32_1 = arith.constant 0 : i32
    return %c0_i32, %c0_i32_0 : i32, i32
  }
  func.func @transform_5(%arg0: i32, %arg1: i32) -> (i32, i32) {
    %c0_i32 = arith.constant 0 : i32
    %c0_i32_0 = arith.constant 0 : i32
    %c0_i32_1 = arith.constant 0 : i32
    return %c0_i32, %c0_i32_0 : i32, i32
  }
  func.func @transform_6(%arg0: i32, %arg1: i32) -> (i32, i32) {
    %c0_i32 = arith.constant 0 : i32
    %c0_i32_0 = arith.constant 0 : i32
    %c0_i32_1 = arith.constant 0 : i32
    return %c0_i32, %c0_i32_0 : i32, i32
  }
  func.func @transform_7(%arg0: i32, %arg1: i32) -> (i32, i32) {
    %c0_i32 = arith.constant 0 : i32
    %c0_i32_0 = arith.constant 0 : i32
    %c0_i32_1 = arith.constant 0 : i32
    return %c0_i32, %c0_i32_0 : i32, i32
  }
  func.func @transform_8(%arg0: i32, %arg1: i32) -> (i32, i32) {
    %c0_i32 = arith.constant 0 : i32
    %c0_i32_0 = arith.constant 0 : i32
    %c0_i32_1 = arith.constant 0 : i32
    return %c0_i32, %c0_i32_0 : i32, i32
  }
  func.func @transform_9(%arg0: i32, %arg1: i32) -> (i32, i32) {
    %c0_i32 = arith.constant 0 : i32
    %c0_i32_0 = arith.constant 0 : i32
    %c0_i32_1 = arith.constant 0 : i32
    return %c0_i32, %c0_i32_0 : i32, i32
  }
  func.func @transform_10(%arg0: i32, %arg1: i32) -> (i32, i32) {
    %c0_i32 = arith.constant 0 : i32
    %c0_i32_0 = arith.constant 0 : i32
    %c0_i32_1 = arith.constant 0 : i32
    return %c0_i32, %c0_i32_0 : i32, i32
  }
  func.func @transform_11(%arg0: i32, %arg1: i32) -> (i32, i32) {
    %c0_i32 = arith.constant 0 : i32
    %c0_i32_0 = arith.constant 0 : i32
    %c0_i32_1 = arith.constant 0 : i32
    return %c0_i32, %c0_i32_0 : i32, i32
  }
  func.func @transform_12(%arg0: i32, %arg1: i32) -> (i32, i32, i32) {
    %c0_i32 = arith.constant 0 : i32
    %c0_i32_0 = arith.constant 0 : i32
    return %arg0, %arg1, %c0_i32 : i32, i32, i32
  }
}

</mosaic_0001>

<bundles_post_ra>
// kernel: tpu_custom_call.1
= control target key start
LH: loop header
LB: loop body
LE: loop exit
PB: predicated region body
PF: predicated region fallthrough
CT: control target
= control target key end

     0   :  { %6 = vsyncpa [#allocation3], 0  ;;  %s124_s0 = inlined_call_operand.hbm [shape: f32[8,128], index: 0, kind: input, shape index: {}]   ;;  %s125_s1 = inlined_call_operand.hbm [shape: f32[8,128], index: 1, kind: output, shape index: {}]  }
   0x1   :  { %7 = vsyncpa [#allocation4], 0  ;;  %s88_s6 = smov [#allocation2]   ;;  %s40_s10 = scalar_lea.hbm %s124_s0, 128 }
   0x2   :  { %s14_s7 = sshll.u32 %s88_s6, 4  ;;  %p41_p0 = scmp.ne.s32.totalorder %s124_s0, %s40_s10  ;;  %s15_s7 = int_to_ptr.vmem [resolvable:$true] %s14_s7 }
   0x3   :  { %p44_p1 = scmp.lt.u32.totalorder %s40_s10, %s124_s0 }
   0x5   :  { %p46_p2 = pnand %p44_p1, %p41_p0 }
   0x7   :  { %49 = shalt.err (!%p46_p2)
}
   0x8   :  { %s50_s15 = scalar_lea.vmem %s15_s7, 128  ;;  %p55_p4 = scmp.lt.s32.totalorder %s15_s7, %s15_s7 }
   0x9   :  { %p51_p3 = scmp.ne.s32.totalorder %s15_s7, %s50_s15  ;;  %p56_p5 = scmp.lt.s32.totalorder %s50_s15, %s50_s15 }
   0xb   :  { %p57_p6 = por %p56_p5, %p55_p4 }
   0xd   :  { %p58_p7 = pnand %p57_p6, %p51_p3 }
   0xf   :  { %61 = shalt.err (!%p58_p7)
}
  0x10   :  { %17 = dma.hbm_to_vmem [thread:$0]  %s124_s0, 128, %s15_s7, [#allocation3]  }
  0x11   :  { %84 = dma.done.wait [#allocation3], 128  }
  0x12   :  { %85 = vsyncadd [#allocation3], 4294967168  ;;  %s89_s18 = smov [#allocation5]   ;;  %v21_v0 = vld [vmem:[#allocation2] sm:$0xff] }
  0x13   :  { %s29_s19 = sshll.u32 %s89_s18, 4  ;;  %22 = vst [vmem:[#allocation5] sm:$0xff] %v21_v0  ;;  %s30_s19 = int_to_ptr.vmem [resolvable:$true] %s29_s19 }
  0x14   :  { %s62_s20 = scalar_lea.vmem %s30_s19, 128  ;;  %p67_p9 = scmp.lt.s32.totalorder %s30_s19, %s30_s19 }
  0x15   :  { %p63_p8 = scmp.ne.s32.totalorder %s30_s19, %s62_s20  ;;  %p68_p10 = scmp.lt.s32.totalorder %s62_s20, %s62_s20 }
  0x17   :  { %p69_p11 = por %p68_p10, %p67_p9 }
  0x19   :  { %p70_p12 = pnand %p69_p11, %p63_p8 }
  0x1b   :  { %73 = shalt.err (!%p70_p12)
}
  0x1c   :  { %s74_s23 = scalar_lea.hbm %s125_s1, 128 }
  0x1d   :  { %p75_p13 = scmp.ne.s32.totalorder %s125_s1, %s74_s23  ;;  %p78_p0 = scmp.lt.u32.totalorder %s74_s23, %s125_s1 }
  0x1f   :  { %p80_p1 = pnand %p78_p0, %p75_p13 }
  0x21   :  { %83 = shalt.err (!%p80_p1)
}
  0x22   :  { %32 = dma.vmem_to_hbm [thread:$0]  %s30_s19, 128, %s125_s1, [#allocation4]  }
  0x23   :  { %86 = dma.done.wait [#allocation4], 128  }
  0x24   :  { %87 = vsyncadd [#allocation4], 4294967168 }
  0x25   :  { %36 = vsyncpa [#allocation3], 1 }
  0x26   :  { %37 = vsyncpa [#allocation4], 1 }

// kernel: tpu_custom_call.1
= control target key start
LH: loop header
LB: loop body
LE: loop exit
PB: predicated region body
PF: predicated region fallthrough
CT: control target
= control target key end

     0   :  { %s2802_s0 = inlined_call_operand.hbm [shape: f32[2,8,32], index: 0, kind: input, shape index: {}]   ;;  %s2803_s1 = inlined_call_operand.hbm [shape: f32[2,8,32], index: 1, kind: input, shape index: {}]   ;;  %s2804_s2 = inlined_call_operand.hbm [shape: f32[2,8,32], index: 2, kind: input, shape index: {}]   ;;  %s2805_s3 = inlined_call_operand.hbm [shape: bf16[2,4,8,8], index: 3, kind: input, shape index: {}]   ;;  %s2806_s4 = inlined_call_operand.hbm [shape: bf16[32,32], index: 4, kind: input, shape index: {}]   ;;  %s2807_s5 = inlined_call_operand.vmem [shape: f32[1,32], index: 5, kind: input, shape index: {}]   ;;  %s2808_s6 = inlined_call_operand.vmem [shape: bf16[32,32], index: 6, kind: input, shape index: {}]   ;;  %s2809_s7 = inlined_call_operand.vmem [shape: f32[1,32], index: 7, kind: input, shape index: {}]   ;;  %s2810_s8 = inlined_call_operand.hbm [shape: bf16[32,32], index: 8, kind: input, shape index: {}]   ;;  %s2811_s9 = inlined_call_operand.hbm [shape: f32[1,32], index: 9, kind: input, shape index: {}]   ;;  %s2812_s10 = inlined_call_operand.vmem [shape: bf16[32,32], index: 10, kind: input, shape index: {}]   ;;  %s2813_s11 = inlined_call_operand.vmem [shape: f32[1,32], index: 11, kind: input, shape index: {}]   ;;  %s2814_s12 = inlined_call_operand.hbm [shape: f32[2,8,32], index: 12, kind: output, shape index: {}]  }
   0x1   :  { %2835 = sst [smem:[#allocation31_spill]] %s2803_s1 }
   0x2   :  { %2836 = sst [smem:[#allocation32_spill]] %s2806_s4 }
   0x3   :  { %2837 = sst [smem:[#allocation33_spill]] %s2807_s5 }
   0x4   :  { %2838 = sst [smem:[#allocation34_spill]] %s2809_s7 }
   0x5   :  { %2839 = sst [smem:[#allocation35_spill]] %s2810_s8 }
   0x6   :  { %2840 = sst [smem:[#allocation36_spill]] %s2812_s10 }
   0x7   :  { %2841 = sst [smem:[#allocation37_spill]] %s2813_s11 }
   0x8   :  { %2842 = sst [smem:[#allocation38_spill]] %s2814_s12 }
   0x9   :  { %17 = vsyncpa [#allocation6], 0 }
   0xa   :  { %19 = vsyncpa [#allocation6 + $0x1], 0 }
   0xb   :  { %20 = vsyncpa [#allocation9], 0 }
   0xc   :  { %22 = vsyncpa [#allocation9 + $0x1], 0 }
   0xd   :  { %23 = vsyncpa [#allocation12], 0 }
   0xe   :  { %25 = vsyncpa [#allocation12 + $0x1], 0 }
   0xf   :  { %26 = vsyncpa [#allocation15], 0 }
  0x10   :  { %27 = vsyncpa [#allocation7], 0 }
  0x11   :  { %29 = vsyncpa [#allocation7 + $0x1], 0  ;;  %s2294_s21 = smov 0   ;;  %s2296_s22 = smov 0  }
  0x12   :  { %s2298_s23 = smov 0   ;;  %s2300_s24 = smov 0  }
  0x13   :  { %s2302_s25 = smov 0   ;;  %s2304_s26 = smov 0  }
  0x14 LB: > { %2843 = sst [smem:[#allocation24_spill]] %s2189_s21  ;;  %s2325_s27 = sadd.s32 4294967295, %s2209_s26   ;;  %s2209_s26 = sphi %s2304_s26, %s35_s26   ;;  %s2205_s25 = sphi %s2302_s25, %s2894_s25   ;;  %s2201_s24 = sphi %s2300_s24, %s2893_s24   ;;  %s2197_s23 = sphi %s2298_s23, %s2889_s23   ;;  %s2193_s22 = sphi %s2296_s22, %s2892_s22   ;;  %s2189_s21 = sphi %s2294_s21, %s2891_s21  }
  0x15   : > { %2844 = sst [smem:[#allocation25_spill]] %s2197_s23  ;;  %s1583_s28 = sadd.s32 4294967294, %s2209_s26  }
  0x16   : > { %2845 = sst [smem:[#allocation26_spill]] %s2201_s24  ;;  %p69_p0 = scmp.ne.s32.totalorder %s2193_s22, %s2189_s21 }
  0x17   : > { %p2818_p1 = scmp.eq.s32.totalorder %s2325_s27, 0  ;;  %p349_p3 = scmp.eq.s32.totalorder %s1583_s28, 1 }
  0x18   : > { %p1584_p5 = scmp.ge.s32.totalorder %s2209_s26, 1  ;;  %p356_p7 = scmp.lt.s32.totalorder %s2209_s26, 3 }
  0x19   : > { %p2334_p4 = por %p2818_p1, %p69_p0  ;;  %p2339_p6 = por %p349_p3, %p69_p0 }
  0x1a   : > { %p2344_p8 = pnand %p1584_p5, %p356_p7  ;;  %s2211_s14 = smov [#allocation13]  }
  0x1b   : > { %s2846_s29 = scalar_select %p2334_p4, 1, 0 }
  0x1c   : > { %s2847_s30 = scalar_select %p2339_p6, 1, 0 }
  0x1d   : > { %s2849_s13 = scalar_select %p2344_p8, 1, 0 }
  0x1e   : > { %2848 = sst [smem:[#allocation27_spill]] %s2847_s30  ;;  %s368_s15 = sshll.u32 %s2211_s14, 4  ;;  %s2348_s15 = int_to_ptr.vmem [resolvable:$true] %s368_s15 }
  0x1f   : > { %p1781_p9 = pneg %p2344_p8  ;;  %s2212_s17 = smov [#allocation14]  }
  0x20   : > { %s390_s18 = sshll.u32 %s2212_s17, 4  ;;  %s2851_s4 = sld [smem:[#allocation32_spill]]  ;;  %s2359_s18 = int_to_ptr.vmem [resolvable:$true] %s390_s18 }
  0x21   : > { %p2355_p11 = pnand %p1781_p9, %p2818_p1 }
  0x23   : > { %s2850_s16 = scalar_select %p2355_p11, 1, 0 }
  0x24   : > { %p2369_p13 = pneg %p2355_p11 }
  0x26   : > { %s1907_s28 = scalar_lea.hbm %s2851_s4, 256 }
  0x27   : > { %p1908_p12 = scmp.ne.s32.totalorder %s2851_s4, %s1907_s28  ;;  %p1914_p5 = scmp.lt.u32.totalorder %s1907_s28, %s2851_s4 }
  0x28   : > { %s2852_s21 = scalar_select %p2369_p13, 1, 0 }
  0x29   : > { %p1910_p0 = pnand %p2369_p13, %p1908_p12 }
  0x2b   : > { %p1911_p3 = pneg %p1910_p0 }
  0x2d   : > { %p1916_p7 = pnand %p1914_p5, %p1911_p3 }
  0x2f   : > { %1919 = shalt.err (!%p1916_p7)
}
  0x30   : > { %s1920_s30 = scalar_lea.vmem %s2348_s15, 256  ;;  %p1928_p2 = scmp.lt.s32.totalorder %s2348_s15, %s2348_s15 }
  0x31   : > { %p1921_p9 = scmp.ne.s32.totalorder %s2348_s15, %s1920_s30  ;;  %p1929_p6 = scmp.lt.s32.totalorder %s1920_s30, %s1920_s30 }
  0x33   : > { %p1923_p10 = pnand %p1921_p9, %p2369_p13  ;;  %p1930_p12 = por %p1929_p6, %p1928_p2 }
  0x35   : > { %p1924_p1 = pneg %p1923_p10 }
  0x37   : > { %p1931_p0 = pnand %p1930_p12, %p1924_p1 }
  0x39   : > { %1934 = shalt.err (!%p1931_p0)
}
  0x3a   : > { %s2820_s19 = smov 64   ;;  %s2821_s12 = smov 4  }
  0x3b   : > { %1784 = dma.hbm_to_vmem [thread:$0]  (!%p2355_p11), %s2851_s4, 256, %s2348_s15, [#allocation12], %s2820_s19, %s2820_s19, %s2821_s12  }
  0x3c   : > { %s2853_s8 = sld [smem:[#allocation35_spill]] }
  0x42   : > { %s1935_s30 = scalar_lea.hbm %s2853_s8, 256 }
  0x43   : > { %p1936_p1 = scmp.ne.s32.totalorder %s2853_s8, %s1935_s30  ;;  %p1942_p10 = scmp.lt.u32.totalorder %s1935_s30, %s2853_s8 }
  0x45   : > { %p1938_p2 = pnand %p1936_p1, %p2369_p13 }
  0x47   : > { %p1939_p6 = pneg %p1938_p2 }
  0x49   : > { %p1944_p3 = pnand %p1942_p10, %p1939_p6 }
  0x4b   : > { %1947 = shalt.err (!%p1944_p3)
}
  0x4c   : > { %s1948_s15 = scalar_lea.vmem %s2359_s18, 256  ;;  %p1956_p12 = scmp.lt.s32.totalorder %s2359_s18, %s2359_s18 }
  0x4d   : > { %p1949_p5 = scmp.ne.s32.totalorder %s2359_s18, %s1948_s15  ;;  %p1957_p0 = scmp.lt.s32.totalorder %s1948_s15, %s1948_s15 }
  0x4f   : > { %p1951_p7 = pnand %p1949_p5, %p2369_p13  ;;  %p1958_p1 = por %p1957_p0, %p1956_p12 }
  0x51   : > { %p1952_p9 = pneg %p1951_p7 }
  0x53   : > { %p1959_p2 = pnand %p1958_p1, %p1952_p9 }
  0x55   : > { %1962 = shalt.err (!%p1959_p2)
}
  0x56   : > { %1787 = dma.hbm_to_vmem [thread:$0]  (!%p2355_p11), %s2853_s8, 256, %s2359_s18, [#allocation15], %s2820_s19, %s2820_s19, %s2821_s12  }
  0x57   : > { %s47_s11 = sadd.s32 1, %s2205_s25  ;;  %s56_s24 = sadd.s32 1, %s2197_s23 }
  0x58   : > { %p49_p6 = scmp.ge.s32.totalorder %s47_s11, 2  ;;  %p63_p10 = scmp.ne.s32.totalorder %s2197_s23, %s2193_s22 }
  0x59   : > { %p64_p3 = scmp.eq.s32.totalorder %s2209_s26, 0  ;;  %p1811_p5 = scmp.lt.s32.totalorder %s2209_s26, 2 }
  0x5a   : > { %s2896_s11 = smov (%p49_p6, %s47_s11), 0  ;;  %p2855_p9 = scmp.eq.s32.totalorder %s2325_s27, 1 }
  0x5b   : > { %2854 = sst [smem:[#allocation28_spill]] %s2896_s11  ;;  %p65_p7 = por %p64_p3, %p63_p10 }
  0x5c   : > { %p2429_p12 = por %p2855_p9, %p63_p10  ;;  %s51_s28 = ssub.s32 %s2205_s25, %s2896_s11 }
  0x5d   : > { %s2436_s18 = sand.u32 1, %s2197_s23   ;;  %p54_p0 = scmp.eq.s32.totalorder %s51_s28, 0 }
  0x5e   : > { %s2856_s20 = scalar_select %p2429_p12, 1, 0 }
  0x5f   : > { %s2439_s14 = sshll.u32 %s2436_s18, 3  ;;  %s2442_s17 = sshll.u32 %s2205_s25, 7 }
  0x60   : > { %2857 = sst [smem:[#allocation29_spill]] %s2856_s20  ;;  %p2444_p1 = pnand %p1811_p5, %p65_p7 }
  0x61   : > { %s2449_s15 = scalar_select %p54_p0, %s2197_s23, %s56_s24  }
  0x62   : > { %s2858_s30 = scalar_select %p2444_p1, 1, 0 }
  0x63   : > { %2859 = sst [smem:[#allocation30_spill]] %s2449_s15  ;;  %s2826_s5 = sand.u32 1, %s2209_s26  }
  0x64   : > { %s2860_s1 = sld [smem:[#allocation31_spill]]  ;;  %s444_s28 = scalar_lea.vmem [#allocation8], %s2439_s14 }
  0x65   : > { %s451_s4 = sshll.u32 %s444_s28, 4  ;;  %s2463_s8 = scalar_lea.sflag [#allocation9], %s2826_s5  ;;  %s2459_s4 = int_to_ptr.vmem [resolvable:$true] %s451_s4 }
  0x66   : > { %p2469_p6 = pneg %p2444_p1 }
  0x6a   : > { %s2456_s12 = scalar_lea.hbm %s2860_s1, %s2442_s17  ;;  %s1968_s28 = scalar_lea.hbm %s2860_s1, 256 }
  0x6b   : > { %s1963_s11 = scalar_lea.hbm %s2456_s12, 128  ;;  %p1969_p5 = scmp.lt.u32.totalorder %s2456_s12, %s2860_s1 }
  0x6c   : > { %p1964_p2 = scmp.ne.s32.totalorder %s2456_s12, %s1963_s11  ;;  %p1970_p7 = scmp.lt.u32.totalorder %s1968_s28, %s1963_s11 }
  0x6d   : > { %p1972_p0 = scmp.lt.u32.totalorder %s1963_s11, %s2456_s12 }
  0x6e   : > { %p1966_p10 = pnand %p2469_p6, %p1964_p2  ;;  %p1971_p9 = por %p1970_p7, %p1969_p5 }
  0x70   : > { %p1967_p3 = pneg %p1966_p10  ;;  %p1973_p12 = por %p1972_p0, %p1971_p9 }
  0x72   : > { %p1974_p4 = pnand %p1973_p12, %p1967_p3 }
  0x74   : > { %1977 = shalt.err (!%p1974_p4)
}
  0x75   : > { %s1978_s5 = scalar_lea.vmem %s2459_s4, 128  ;;  %s2215_s19 = smov [#allocation8]  }
  0x76   : > { %p1979_p2 = scmp.ne.s32.totalorder %s2459_s4, %s1978_s5  ;;  %s1983_s10 = sshll.u32 %s2215_s19, 4  ;;  %s1984_s10 = int_to_ptr.vmem [resolvable:$false] %s1983_s10 }
  0x77   : > { %s1985_s23 = scalar_lea.vmem %s1984_s10, 256  ;;  %p1986_p11 = scmp.lt.s32.totalorder %s2459_s4, %s1984_s10 }
  0x78   : > { %p1981_p10 = pnand %p1979_p2, %p2469_p6  ;;  %p1987_p13 = scmp.lt.s32.totalorder %s1985_s23, %s1978_s5 }
  0x7a   : > { %p1982_p8 = pneg %p1981_p10  ;;  %p1988_p5 = por %p1987_p13, %p1986_p11 }
  0x7c   : > { %p1989_p7 = pnand %p1988_p5, %p1982_p8 }
  0x7e   : > { %1992 = shalt.err (!%p1989_p7)
}
  0x7f   : > { %1797 = dma.hbm_to_vmem [thread:$0]  (!%p2444_p1), %s2456_s12, 128, %s2459_s4, %s2463_s8  }
  0x80   : > { %s1595_s11 = sshll.u32 %s2436_s18, 4  ;;  %s2216_s15 = smov [#allocation16]  }
  0x81   : > { %s404_s28 = sshll.u32 %s2216_s15, 4  ;;  %s480_s1 = scalar_lea.vmem [#allocation11], %s1595_s11  ;;  %s405_s28 = int_to_ptr.vmem [resolvable:$true] %s404_s28 }
  0x82   : > { %s488_s19 = sshll.u32 %s480_s1, 4  ;;  %s1993_s23 = scalar_lea.hbm %s2811_s9, 16  ;;  %s2494_s19 = int_to_ptr.vmem [resolvable:$true] %s488_s19 }
  0x83   : > { %p1994_p4 = scmp.ne.s32.totalorder %s2811_s9, %s1993_s23  ;;  %p2862_p8 = scmp.ne.s32.totalorder %s2852_s21, 0 }
  0x84   : > { %p2000_p12 = scmp.lt.u32.totalorder %s1993_s23, %s2811_s9 }
  0x85   : > { %p1996_p11 = pnand %p1994_p4, %p2862_p8 }
  0x87   : > { %p1997_p13 = pneg %p1996_p11 }
  0x89   : > { %p2002_p3 = pnand %p2000_p12, %p1997_p13 }
  0x8b   : > { %2005 = shalt.err (!%p2002_p3)
}
  0x8c   : > { %s2006_s1 = scalar_lea.vmem %s405_s28, 16  ;;  %s2013_s11 = scalar_lea.vmem %s405_s28, 32 }
  0x8d   : > { %p2007_p9 = scmp.ne.s32.totalorder %s405_s28, %s2006_s1  ;;  %p2014_p10 = scmp.lt.s32.totalorder %s405_s28, %s405_s28 }
  0x8e   : > { %p2015_p5 = scmp.lt.s32.totalorder %s2013_s11, %s2006_s1 }
  0x8f   : > { %p2009_p0 = pnand %p2007_p9, %p2862_p8 }
  0x90   : > { %p2016_p7 = por %p2015_p5, %p2014_p10 }
  0x91   : > { %p2010_p2 = pneg %p2009_p0 }
  0x93   : > { %p2017_p1 = pnand %p2016_p7, %p2010_p2 }
  0x95   : > { %2020 = shalt.err (!%p2017_p1)
}
  0x96   : > { %p2863_p4 = scmp.ne.s32.totalorder %s2850_s16, 0  ;;  %s2518_s5 = scalar_lea.hbm %s2802_s0, %s2442_s17 }
  0x97   : > { %s425_s10 = scalar_lea.vmem [#allocation5], %s2439_s14  ;;  %s2527_s12 = scalar_lea.hbm %s2804_s2, %s2442_s17 }
  0x98   : > { %1790 = dma.hbm_to_vmem [thread:$0]  (!%p2863_p4), %s2811_s9, 16, %s405_s28, [#allocation15]  }
  0x99   : > { %s433_s16 = sshll.u32 %s425_s10, 4  ;;  %s422_s1 = scalar_lea.sflag [#allocation6], %s2436_s18  ;;  %s2521_s16 = int_to_ptr.vmem [resolvable:$true] %s433_s16 }
  0x9a   : > { %s2021_s28 = scalar_lea.hbm %s2518_s5, 128  ;;  %s2026_s20 = scalar_lea.hbm %s2802_s0, 256 }
  0x9b   : > { %p2022_p1 = scmp.ne.s32.totalorder %s2518_s5, %s2021_s28  ;;  %p2027_p13 = scmp.lt.u32.totalorder %s2518_s5, %s2802_s0 }
  0x9c   : > { %p2028_p12 = scmp.lt.u32.totalorder %s2026_s20, %s2021_s28  ;;  %p2030_p9 = scmp.lt.u32.totalorder %s2021_s28, %s2518_s5 }
  0x9d   : > { %p2024_p8 = pnand %p2022_p1, %p2469_p6 }
  0x9e   : > { %p2029_p3 = por %p2028_p12, %p2027_p13 }
  0x9f   : > { %p2025_p11 = pneg %p2024_p8 }
  0xa0   : > { %p2031_p0 = por %p2030_p9, %p2029_p3 }
  0xa2   : > { %p2032_p2 = pnand %p2031_p0, %p2025_p11 }
  0xa4   : > { %2035 = shalt.err (!%p2032_p2)
}
  0xa5   : > { %s2036_s18 = scalar_lea.vmem %s2521_s16, 128  ;;  %s2217_s17 = smov [#allocation5]  }
  0xa6   : > { %p2037_p10 = scmp.ne.s32.totalorder %s2521_s16, %s2036_s18  ;;  %s2041_s10 = sshll.u32 %s2217_s17, 4  ;;  %s2042_s10 = int_to_ptr.vmem [resolvable:$false] %s2041_s10 }
  0xa7   : > { %s2043_s23 = scalar_lea.vmem %s2042_s10, 256  ;;  %p2044_p4 = scmp.lt.s32.totalorder %s2521_s16, %s2042_s10 }
  0xa8   : > { %p2039_p5 = pnand %p2037_p10, %p2469_p6  ;;  %p2045_p1 = scmp.lt.s32.totalorder %s2043_s23, %s2036_s18 }
  0xaa   : > { %p2040_p7 = pneg %p2039_p5  ;;  %p2046_p8 = por %p2045_p1, %p2044_p4 }
  0xac   : > { %p2047_p13 = pnand %p2046_p8, %p2040_p7 }
  0xae   : > { %2050 = shalt.err (!%p2047_p13)
}
  0xaf   : > { %p2864_p11 = scmp.ne.s32.totalorder %s2858_s30, 0  ;;  %s462_s4 = scalar_lea.vmem [#allocation10], %s2439_s14 }
  0xb0   : > { %s469_s28 = sshll.u32 %s462_s4, 4  ;;  %s1647_s11 = sshll.u32 %s2205_s25, 8  ;;  %s470_s28 = int_to_ptr.vmem [resolvable:$true] %s469_s28 }
  0xb1   : > { %1794 = dma.hbm_to_vmem [thread:$0]  (!%p2864_p11), %s2518_s5, 128, %s2521_s16, %s422_s1  }
  0xb2   : > { %s2556_s21 = scalar_lea.hbm %s2805_s3, %s1647_s11  ;;  %s2051_s15 = scalar_lea.hbm %s2527_s12, 128 }
  0xb3   : > { %p2052_p12 = scmp.ne.s32.totalorder %s2527_s12, %s2051_s15  ;;  %s2056_s10 = scalar_lea.hbm %s2804_s2, 256 }
  0xb4   : > { %p2057_p0 = scmp.lt.u32.totalorder %s2527_s12, %s2804_s2  ;;  %p2058_p2 = scmp.lt.u32.totalorder %s2056_s10, %s2051_s15 }
  0xb5   : > { %p2054_p3 = pnand %p2052_p12, %p2469_p6  ;;  %p2060_p5 = scmp.lt.u32.totalorder %s2051_s15, %s2527_s12 }
  0xb6   : > { %p2059_p10 = por %p2058_p2, %p2057_p0 }
  0xb7   : > { %p2055_p9 = pneg %p2054_p3 }
  0xb8   : > { %p2061_p7 = por %p2060_p5, %p2059_p10 }
  0xba   : > { %p2062_p4 = pnand %p2061_p7, %p2055_p9 }
  0xbc   : > { %2065 = shalt.err (!%p2062_p4)
}
  0xbd   : > { %s2066_s14 = scalar_lea.vmem %s470_s28, 128  ;;  %s2218_s16 = smov [#allocation10]  }
  0xbe   : > { %p2067_p1 = scmp.ne.s32.totalorder %s470_s28, %s2066_s14  ;;  %s2071_s1 = sshll.u32 %s2218_s16, 4  ;;  %s2072_s1 = int_to_ptr.vmem [resolvable:$false] %s2071_s1 }
  0xbf   : > { %s2073_s4 = scalar_lea.vmem %s2072_s1, 256  ;;  %p2074_p12 = scmp.lt.s32.totalorder %s470_s28, %s2072_s1 }
  0xc0   : > { %p2069_p8 = pnand %p2067_p1, %p2469_p6  ;;  %p2075_p3 = scmp.lt.s32.totalorder %s2073_s4, %s2066_s14 }
  0xc2   : > { %p2070_p13 = pneg %p2069_p8  ;;  %p2076_p11 = por %p2075_p3, %p2074_p12 }
  0xc4   : > { %p2077_p0 = pnand %p2076_p11, %p2070_p13 }
  0xc6   : > { %2080 = shalt.err (!%p2077_p0)
}
  0xc7   : > { %p2865_p2 = scmp.ne.s32.totalorder %s2858_s30, 0  ;;  %s2866_s11 = sand.u32 1, %s2209_s26  }
  0xc8   : > { %s2578_s7 = scalar_lea.sflag [#allocation12], %s2866_s11  ;;  %s2081_s20 = scalar_lea.hbm %s2556_s21, 256 }
  0xc9   : > { %1800 = dma.hbm_to_vmem [thread:$0]  (!%p2865_p2), %s2527_s12, 128, %s470_s28, %s2463_s8  }
  0xca   : > { %p2082_p9 = scmp.ne.s32.totalorder %s2556_s21, %s2081_s20  ;;  %s2086_s17 = scalar_lea.hbm %s2805_s3, 512 }
  0xcb   : > { %p2087_p5 = scmp.lt.u32.totalorder %s2556_s21, %s2805_s3  ;;  %p2088_p7 = scmp.lt.u32.totalorder %s2086_s17, %s2081_s20 }
  0xcc   : > { %p2084_p10 = pnand %p2082_p9, %p2469_p6  ;;  %p2090_p1 = scmp.lt.u32.totalorder %s2081_s20, %s2556_s21 }
  0xcd   : > { %p2089_p4 = por %p2088_p7, %p2087_p5 }
  0xce   : > { %p2085_p11 = pneg %p2084_p10 }
  0xcf   : > { %p2091_p8 = por %p2090_p1, %p2089_p4 }
  0xd1   : > { %p2092_p13 = pnand %p2091_p8, %p2085_p11 }
  0xd3   : > { %2095 = shalt.err (!%p2092_p13)
}
  0xd4   : > { %s2096_s8 = scalar_lea.vmem %s2494_s19, 256  ;;  %s2219_s12 = smov [#allocation11]  }
  0xd5   : > { %p2097_p12 = scmp.ne.s32.totalorder %s2494_s19, %s2096_s8  ;;  %s2101_s28 = sshll.u32 %s2219_s12, 4  ;;  %s2102_s28 = int_to_ptr.vmem [resolvable:$false] %s2101_s28 }
  0xd6   : > { %s2103_s5 = scalar_lea.vmem %s2102_s28, 512  ;;  %p2104_p9 = scmp.lt.s32.totalorder %s2494_s19, %s2102_s28 }
  0xd7   : > { %p2099_p3 = pnand %p2097_p12, %p2469_p6  ;;  %p2105_p10 = scmp.lt.s32.totalorder %s2103_s5, %s2096_s8 }
  0xd9   : > { %p2100_p0 = pneg %p2099_p3  ;;  %p2106_p5 = por %p2105_p10, %p2104_p9 }
  0xdb   : > { %p2107_p7 = pnand %p2106_p5, %p2100_p0 }
  0xdd   : > { %2110 = shalt.err (!%p2107_p7)
}
  0xde   : > { %s2867_s14 = smov 4   ;;  %s2868_s16 = smov 64  }
  0xdf   : > { %1803 = dma.hbm_to_vmem [thread:$0]  (!%p2865_p2), %s2556_s21, 256, %s2494_s19, %s2578_s7, %s2868_s16, %s2868_s16, %s2867_s14  }
  0xe0   : > { %p2869_p6 = scmp.ne.s32.totalorder %s2849_s13, 0 }
  0xe1   : > { %s2608_s24 = sand.u32 (!%p2869_p6), 1, %s2193_s22   ;;  %p2870_p11 = scmp.ne.s32.totalorder (!%p2869_p6), %s2846_s29, 0 }
  0xe2   : > { %500 = sbr.rel (%p2869_p6) target bundleno = 1717 (0x6b5), region = 68  ;;  %s2611_s1 = sshll.u32 (!%p2869_p6), %s2608_s24, 3 }
  0xe3   : > { %s503_s30 = scalar_lea.sflag (!%p2869_p6), [#allocation6], %s2608_s24  ;;  %s506_s4 = scalar_lea.vmem (!%p2869_p6), [#allocation5], %s2611_s1 }
  0xe9   : > { %2164 = dma.done.wait (%p2870_p11), %s503_s30, 128  }
  0xea   : > { %2166 = vsyncadd (%p2870_p11), %s503_s30, 4294967168  ;;  %s511_s13 = sand.u32 1, %s2325_s27   ;;  %s515_s21 = scalar_lea.vmem [#allocation8], %s2611_s1 }
  0xeb   : > { %s512_s19 = scalar_lea.sflag [#allocation9], %s511_s13 }
  0xec   : > { %2168 = dma.done.wait (%p2870_p11), %s512_s19, 256  }
  0xed   : > { %2170 = vsyncadd (%p2870_p11), %s512_s19, 4294967040  ;;  %s1602_s11 = sshll.u32 %s2608_s24, 4  ;;  %s524_s7 = scalar_lea.vmem [#allocation10], %s2611_s1 }
  0xee   : > { %s530_s20 = scalar_lea.sflag [#allocation12], %s511_s13  ;;  %s2627_s15 = scalar_lea.vmem [#allocation11], %s1602_s11 }
  0xef   : > { %2172 = dma.done.wait (%p2870_p11), %s530_s20, 256  }
  0xf0   : > { %2174 = vsyncadd (%p2870_p11), %s530_s20, 4294967040  ;;  %p2871_p2 = scmp.eq.s32.totalorder %s2325_s27, 0 }
  0xf2   : > { %2176 = dma.done.wait (%p2871_p2), [#allocation12], 256   ;;  %p2872_p4 = pmov %p2871_p2 }
  0xf3   : > { %p2873_p1 = pmov %p2871_p2 }
  0xf4   : > { %2178 = vsyncadd (%p2872_p4), [#allocation12], 4294967040 }
  0xf5   : > { %2180 = dma.done.wait (%p2873_p1), [#allocation15], 272   ;;  %p2874_p8 = pmov %p2873_p1 }
  0xf6   : > { %v2220_v0 = vmov 0.0   ;;  %vm2221_vm0 = vmmov 0   ;;  %v1877_v1 = vld [vmem:[%s2808_s6] sm:$0xff]   ;;  %v1878_v2 = vld [vmem:[%s2808_s6 + $0x8] sm:$0xff]   ;;  %vm633_vm1 = vcmask 261120   ;;  %v1882_v10 = vld [vmem:[#allocation14 + $0x8] sm:$0xff]  }
  0xf7   : > { %2182 = vsyncadd (%p2874_p8), [#allocation15], 4294967024  ;;  %1679 = vmatprep.subr.bf16.mxu0 %v2220_v0  ;;  %1683 = vmatprep.mubr.msk.bf16.mxu0 %vm2221_vm0, %v2220_v0  ;;  %v606_v3 = vld [vmem:[%s515_s21] sm:$0xff]  ;;  %v748_v7 = vld [vmem:[%s506_s4] sm:$0xff]  ;;  %s2875_s8 = sld [smem:[#allocation34_spill]]  ;;  %vm744_vm2 = vcmask 257024  }
  0xf8   : > { %1687 = vmatprep.subr.bf16.mxu1 %v2220_v0  ;;  %1691 = vmatprep.mubr.msk.bf16.mxu1 %vm2221_vm0, %v2220_v0  ;;  %v1879_v4 = vld [vmem:[#allocation13] sm:$0xff]   ;;  %v607_v5 = vpack.c.bf16 %v606_v3, %v606_v3  ;;  %v1880_v6 = vld [vmem:[#allocation13 + $0x8] sm:$0xff]   ;;  %v749_v8 = vpack.c.bf16 %v748_v7, %v748_v7  ;;  %v1881_v9 = vld [vmem:[#allocation14] sm:$0xff]   ;;  %s2876_s5 = sld [smem:[#allocation33_spill]]  ;;  %vm823_vm3 = vcmask 64512   ;;  %s2222_s14 = smov 112  }
  0xf9   : > { %1680 = vmatpush3.bf16.msra.mxu0 %v1877_v1  ;;  %1688 = vmatpush3.bf16.msra.mxu1 %v1881_v9  ;;  %v608_v11 = vld [vmem:[%s524_s7] sm:$0xff]  ;;  %s2223_s16 = smov 120   ;;  %s2224_s30 = smov 104   ;;  %v1611_v33 = vld [vmem:[#allocation16] ss:$0 sm:$0xff]  ;;  %vm885_vm4 = vcmask 1043456  }
  0xfa   : > { %1681 = vmatprep.subr.bf16.mxu0 %v2220_v0  ;;  %1689 = vmatprep.subr.bf16.mxu1 %v2220_v0  ;;  %v609_v12 = vpack.c.bf16 %v608_v11, %v608_v11  ;;  %v821_v51 = vld [vmem:[%s2627_s15] sm:$0xff]   ;;  %v1627_v1 = vld [vmem:[%s2627_s15 + $0x8] sm:$0xff]   ;;  %vm930_vm5 = vcmask 60416   ;;  %s2225_s4 = smov 8   ;;  %s2877_s21 = sld [smem:[#allocation36_spill]]  ;;  %vm1061_vm6 = vcmask 126016  }
  0xfb   : > { %v822_v52 = vunpack.c.l.bf16 %v821_v51  ;;  %v936_v59 = vunpack.c.h.bf16 %v821_v51  ;;  %v1197_v11 = vunpack.c.h.bf16 %v1627_v1  ;;  %s2226_s15 = smov 16   ;;  %s2879_s29 = sld [smem:[#allocation26_spill]]  ;;  %vm1191_vm7 = vcmask 191616  }
  0xfc   : > { %s2227_s18 = smov 24   ;;  %vm1321_vm8 = vcmask 257216   ;;  %s2880_s10 = sld [smem:[#allocation37_spill]] }
  0xfd   : > { %1682 = vmatpush3.bf16.msra.mxu0 %v1878_v2  ;;  %1690 = vmatpush3.bf16.msra.mxu1 %v1882_v10  ;;  %v1607_v13 = vld [vmem:[%s2875_s8] ss:$0 sm:$0xff]  ;;  %s2881_s23 = sld [smem:[#allocation29_spill]]  ;;  %s600_s12 = scalar_lea.vmem [#allocation17], %s2611_s1 }
  0xfe   : > { %1695 = vmatprep.subr.bf16.mxu0 %v2220_v0  ;;  %1703 = vmatprep.subr.bf16.mxu1 %v2220_v0  ;;  %v1615_v20 = vld [vmem:[%s2876_s5] ss:$0 sm:$0xff]  ;;  %s1406_s28 = sshll.u32 %s600_s12, 4  ;;  %s2228_s13 = smov [#allocation17]   ;;  %s2754_s28 = int_to_ptr.vmem [resolvable:$true] %s1406_s28 }
  0xff   : > { %s2111_s1 = scalar_lea.vmem %s2754_s28, 128  ;;  %s2115_s19 = sshll.u32 %s2228_s13, 4  ;;  %s2116_s19 = int_to_ptr.vmem [resolvable:$false] %s2115_s19 }
 0x100   : > { %1684 = vmatmul.mubr.msk.bf16.vlgmr.msra.gmra.mrb[0].mxu0 %vm633_vm1, %v607_v5  ;;  %1692 = vmatmul.mubr.msk.bf16.vlgmr.msra.gmra.mrb[0].mxu1 %vm633_vm1, %v609_v12  ;;  %s2878_s11 = smov %s2877_s21  ;;  %p2112_p13 = scmp.ne.s32.totalorder %s2754_s28, %s2111_s1 }
 0x101   : > { %1696 = vmatpush3.bf16.msra.mxu0 %v1879_v4  ;;  %1699 = vmatprep.mubr.msk.bf16.mxu0 %vm2221_vm0, %v2220_v0  ;;  %v1067_v4 = vunpack.c.l.bf16 %v1627_v1  ;;  %s1644_s8 = sshll.u32 %s2879_s29, 7  ;;  %p2118_p9 = scmp.lt.s32.totalorder %s2754_s28, %s2116_s19 }
 0x102   : > { %1697 = vmatprep.subr.bf16.mxu0 %v2220_v0  ;;  %1705 = vmatprep.mubr.msk.bf16.mxu1 %vm2221_vm0, %v2220_v0 }
 0x103   : > { %p2883_p12 = scmp.ne.s32.totalorder %s2881_s23, 0 }
 0x105   : > { %1698 = vmatpush3.bf16.msra.mxu0 %v1880_v6  ;;  %p2113_p3 = pnand %p2112_p13, %p2883_p12 }
 0x106   : > { %1709 = vmatprep.subr.bf16.mxu0 %v2220_v0 }
 0x107   : > { %p2114_p0 = pneg %p2113_p3 }
 0x108   : > { %1700 = vmatmul.mubr.msk.bf16.vlgmr.msra.gmra.mrb[4].mxu0 %vm633_vm1, %v749_v8 }
 0x109   : > { %1711 = vmatprep.mubr.msk.bf16.mxu0 %vm2221_vm0, %v2220_v0 }
 0x1d3   : > { %v671_v14 = vpop.f32.mrb[0].mxu0  ;;  %v737_v34 = vpop.f32.mrb[0].mxu1 }
 0x1d4   : > { %v672_v15 = vadd.f32 %v1607_v13, %v671_v14  ;;  %v1685_v16 = vpop.f32.mrb[1].mxu0  ;;  %v738_v35 = vadd.f32 %v1611_v33, %v737_v34  ;;  %v1693_v36 = vpop.f32.mrb[1].mxu1 }
 0x1d5   : > { %v674_v17 = vpop.f32.mrb[2].mxu0  ;;  %v740_v37 = vpop.f32.mrb[2].mxu1 }
 0x1d6   : > { %v743_v18 = vpack.c.bf16 %v672_v15, %v672_v15  ;;  %v1686_v19 = vpop.f32.mrb[3].mxu0  ;;  %v746_v38 = vpack.c.bf16 %v738_v35, %v738_v35  ;;  %v1694_v39 = vpop.f32.mrb[3].mxu1 }
 0x1d8   : > { %745 = vst.msk [vmem:[#allocation2] sm:$0xf] %vm744_vm2, %v743_v18  ;;  %747 = vst.msk [vmem:[#allocation3] sm:$0xf] %vm744_vm2, %v746_v38 }
 0x1db   : > { %v811_v21 = vpop.f32.mrb[4].mxu0 }
 0x1dc   : > { %v812_v22 = vadd.f32 %v1615_v20, %v811_v21  ;;  %v1701_v23 = vpop.f32.mrb[5].mxu0 }
 0x1dd   : > { %v814_v24 = vpop.f32.mrb[6].mxu0 }
 0x1de   : > { %v817_v25 = vmul.f32 0.35355338, %v812_v22  ;;  %v1702_v26 = vpop.f32.mrb[7].mxu0 }
 0x1df   : > { %v819_v27 = vld [vmem:[#allocation2] sm:$0xf]  ;;  %v820_v40 = vld [vmem:[#allocation3] sm:$0xf] }
 0x1e0   : > { %v1883_v28 = vld [vmem:[#allocation2] ss:$0 sps:$4 sm:$0xff]   ;;  %v828_v29 = vsel %vm823_vm3, %v819_v27, 0  ;;  %v818_v31 = vpack.c.bf16 %v817_v25, %v817_v25  ;;  %v887_v41 = vsel %vm885_vm4, %v820_v40, 0  ;;  %v1886_v23 = vld [vmem:[#allocation3] ss:$0 sps:$4 sm:$0xff]  }
 0x1e1   : > { %v1884_v30 = vld [vmem:[#allocation2] ss:$0 sps:$4 sm:$0xff]   ;;  %1704 = vmatpush3.bf16.xpose.msra.mxu1 %v828_v29  ;;  %1073 = vrot.lane.b32.xlu1 %v1883_v28, %s2222_s14  ;;  %v1887_v39 = vld [vmem:[#allocation3] ss:$0 sps:$4 sm:$0xff]  }
 0x1e2   : > { %943 = vrot.lane.b32.xlu0 %v1884_v30, %s2223_s16  ;;  %1715 = vmatprep.subr.bf16.mxu1 %v2220_v0  ;;  %v1885_v32 = vld [vmem:[#allocation2] ss:$0 sps:$4 sm:$0xff]  }
 0x1e3   : > { %1710 = vmatpush3.bf16.msra.mxu0 %v887_v41 }
 0x1e4   : > { %1721 = vmatprep.subr.bf16.mxu0 %v2220_v0 }
 0x1e5   : > { %1068 = vrot.lane.b32.xlu1 %v818_v31, %s2222_s14 }
 0x1e6   : > { %938 = vrot.lane.b32.xlu0 %v818_v31, %s2223_s16 }
 0x1e8   : > { %1706 = vmatmul.mubr.msk.bf16.vlgmr.msra.gmra.mrb[4].mxu1 %vm823_vm3, %v818_v31 }
 0x1e9   : > { %1198 = vrot.lane.b32.xlu1 %v818_v31, %s2224_s30  ;;  %1717 = vmatprep.mubr.msk.bf16.mxu1 %vm2221_vm0, %v2220_v0 }
 0x1ea   : > { %1203 = vrot.lane.b32.xlu0 %v1885_v32, %s2224_s30 }
 0x253   : > { %v1074_v44 = vpop.permute.xlu1 %1073 }
 0x254   : > { %v944_v42 = vpop.permute.xlu0 %943  ;;  %v1079_v46 = vsel %vm823_vm3, %v1074_v44, 0 }
 0x255   : > { %v949_v43 = vsel %vm823_vm3, %v944_v42, 0 }
 0x256   : > { %1716 = vmatpush3.bf16.xpose.msra.mxu1 %v949_v43  ;;  %v1888_v43 = vld [vmem:[#allocation3] ss:$0 sps:$4 sm:$0xff]  }
 0x257   : > { %1727 = vmatprep.subr.bf16.mxu1 %v2220_v0  ;;  %v1069_v48 = vpop.permute.xlu1 %1068 }
 0x258   : > { %v939_v45 = vpop.permute.xlu0 %938 }
 0x25b   : > { %v1199_v50 = vpop.permute.xlu1 %1198 }
 0x25c   : > { %v1204_v47 = vpop.permute.xlu0 %1203 }
 0x25d   : > { %1718 = vmatmul.mubr.msk.bf16.vlgmr.msra.gmra.mrb[8].mxu1 %vm823_vm3, %v939_v45  ;;  %v1209_v49 = vsel %vm823_vm3, %v1204_v47, 0 }
 0x25e   : > { %1728 = vmatpush3.bf16.xpose.msra.mxu1 %v1079_v46  ;;  %1729 = vmatprep.mubr.msk.bf16.mxu1 %vm2221_vm0, %v2220_v0 }
 0x25f   : > { %1739 = vmatprep.subr.bf16.mxu1 %v2220_v0 }
 0x265   : > { %1730 = vmatmul.mubr.msk.bf16.vlgmr.msra.gmra.mrb[12].mxu1 %vm823_vm3, %v1069_v48 }
 0x266   : > { %1740 = vmatpush3.bf16.xpose.msra.mxu1 %v1209_v49  ;;  %1741 = vmatprep.mubr.msk.bf16.mxu1 %vm2221_vm0, %v2220_v0 }
 0x267   : > { %1751 = vmatprep.subr.bf16.mxu1 %v2220_v0 }
 0x26d   : > { %1742 = vmatmul.mubr.msk.bf16.vlgmr.msra.gmra.mrb[16].mxu1 %vm823_vm3, %v1199_v50 }
 0x26e   : > { %1755 = vmatprep.mubr.msk.bf16.mxu1 %vm2221_vm0, %v2220_v0 }
 0x2bb   : > { %v864_v53 = vpop.f32.mrb[4].mxu1 }
 0x2bc   : > { %v865_v54 = vadd.f32 %v864_v53, %v822_v52  ;;  %v1707_v55 = vpop.f32.mrb[5].mxu1 }
 0x2bd   : > { %v867_v56 = vpop.f32.mrb[6].mxu1 }
 0x2be   : > { %v1708_v57 = vpop.f32.mrb[7].mxu1  ;;  %v870_v58 = vsel %vm823_vm3, %v865_v54, -inf }
 0x2bf   : > { %871 = vmax.xlane.f32.xlu0 %v870_v58 }
 0x330   : > { %v985_v60 = vpop.f32.mrb[8].mxu1 }
 0x331   : > { %v986_v61 = vadd.f32 %v985_v60, %v936_v59  ;;  %v1719_v62 = vpop.f32.mrb[9].mxu1 }
 0x332   : > { %v988_v63 = vpop.f32.mrb[10].mxu1 }
 0x333   : > { %v1720_v2 = vpop.f32.mrb[11].mxu1  ;;  %v991_v3 = vsel %vm823_vm3, %v986_v61, -inf }
 0x334   : > { %992 = vmax.xlane.f32.xlu1 %v991_v3 }
 0x338   : > { %v1115_v5 = vpop.f32.mrb[12].mxu1 }
 0x339   : > { %v1116_v6 = vadd.f32 %v1115_v5, %v1067_v4  ;;  %v1731_v7 = vpop.f32.mrb[13].mxu1 }
 0x33a   : > { %v1118_v8 = vpop.f32.mrb[14].mxu1 }
 0x33b   : > { %v1732_v9 = vpop.f32.mrb[15].mxu1  ;;  %v1121_v10 = vsel %vm823_vm3, %v1116_v6, -inf }
 0x33c   : > { %1122 = vmax.xlane.f32.xlu0 %v1121_v10  ;;  %v1889_v10 = vld [vmem:[%s2877_s21] sm:$0xff]   ;;  %s2117_s21 = scalar_lea.vmem %s2116_s19, 256 }
 0x33d   : > { %1752 = vmatpush3.bf16.msra.mxu1 %v1889_v10  ;;  %p2119_p10 = scmp.lt.s32.totalorder %s2117_s21, %s2111_s1 }
 0x33e   : > { %1753 = vmatprep.subr.bf16.mxu1 %v2220_v0 }
 0x33f   : > { %p2120_p5 = por %p2119_p10, %p2118_p9 }
 0x340   : > { %v1245_v12 = vpop.f32.mrb[16].mxu1 }
 0x341   : > { %v1246_v13 = vadd.f32 %v1245_v12, %v1197_v11  ;;  %v1743_v14 = vpop.f32.mrb[17].mxu1  ;;  %v1890_v12 = vld [vmem:[%s2878_s11 + $0x8] sm:$0xff]   ;;  %p2121_p7 = pnand %p2120_p5, %p2114_p0 }
 0x342   : > { %v1248_v15 = vpop.f32.mrb[18].mxu1  ;;  %1754 = vmatpush3.bf16.msra.mxu1 %v1890_v12 }
 0x343   : > { %v1744_v16 = vpop.f32.mrb[19].mxu1  ;;  %v1251_v17 = vsel %vm823_vm3, %v1246_v13, -inf }
 0x344   : > { %1252 = vmax.xlane.f32.xlu0 %v1251_v17 }
 0x34c   : > { %v872_v18 = vpop.xlane.xlu0 %871 }
 0x34d   : > { %v873_v19 = vsub.f32 %v865_v54, %v872_v18 }
 0x34f   : > { %v874_v20 = vmul.f32 1.442695, %v873_v19 }
 0x351   : > { %1891 = vpow2.f32 %v874_v20 }
 0x35b   : > { %v1892_v21 = vpop.eup %1891 }
 0x35c   : > { %v876_v22 = vsel %vm823_vm3, %v1892_v21, 0.0 }
 0x35d   : > { %877 = vadd.xlane.f32.xlu1 %v876_v22 }
 0x36e   : > { %1006 = vrot.lane.b32.xlu1 %v1886_v23, %s2223_s16  ;;  %s2882_s16 = sld [smem:[#allocation38_spill]] }
 0x3c1   : > { %v993_v24 = vpop.xlane.xlu1 %992 }
 0x3c2   : > { %v994_v25 = vsub.f32 %v986_v61, %v993_v24 }
 0x3c4   : > { %v995_v26 = vmul.f32 1.442695, %v994_v25  ;;  %v1639_v25 = vld [vmem:[%s2880_s10] ss:$0 sm:$0xff] }
 0x3c6   : > { %1893 = vpow2.f32 %v995_v26 }
 0x3c9   : > { %v1123_v27 = vpop.xlane.xlu0 %1122 }
 0x3ca   : > { %v1124_v28 = vsub.f32 %v1116_v6, %v1123_v27 }
 0x3cc   : > { %v1125_v29 = vmul.f32 1.442695, %v1124_v28 }
 0x3ce   : > { %1895 = vpow2.f32 %v1125_v29 }
 0x3d0   : > { %v1894_v30 = vpop.eup %1893 }
 0x3d1   : > { %v1253_v31 = vpop.xlane.xlu0 %1252  ;;  %v997_v32 = vsel %vm823_vm3, %v1894_v30, 0.0 }
 0x3d2   : > { %v1254_v33 = vsub.f32 %v1246_v13, %v1253_v31  ;;  %998 = vadd.xlane.f32.xlu0 %v997_v32 }
 0x3d4   : > { %v1255_v34 = vmul.f32 1.442695, %v1254_v33 }
 0x3d6   : > { %1897 = vpow2.f32 %v1255_v34 }
 0x3d8   : > { %v1896_v35 = vpop.eup %1895 }
 0x3d9   : > { %v1127_v36 = vsel %vm823_vm3, %v1896_v35, 0.0 }
 0x3da   : > { %1128 = vadd.xlane.f32.xlu1 %v1127_v36 }
 0x3e0   : > { %v1898_v37 = vpop.eup %1897 }
 0x3e1   : > { %v1257_v38 = vsel %vm823_vm3, %v1898_v37, 0.0 }
 0x3e2   : > { %1258 = vadd.xlane.f32.xlu0 %v1257_v38 }
 0x3ea   : > { %v878_v40 = vpop.xlane.xlu1 %877 }
 0x3eb   : > { %1899 = vrcp.f32 %v878_v40  ;;  %1266 = vrot.lane.b32.xlu1 %v1887_v39, %s2224_s30  ;;  %s2752_s30 = scalar_lea.hbm %s2882_s16, %s1644_s8 }
 0x3ee   : > { %v1007_v44 = vpop.permute.xlu1 %1006 }
 0x3ef   : > { %v1012_v46 = vsel %vm885_vm4, %v1007_v44, 0 }
 0x3f5   : > { %v1900_v41 = vpop.eup %1899 }
 0x3f6   : > { %v880_v42 = vmul.f32 %v1900_v41, %v1892_v21 }
 0x3f8   : > { %1136 = vrot.lane.b32.xlu0 %v1888_v43, %s2222_s14  ;;  %v881_v45 = vpack.c.bf16 %v880_v42, %v880_v42 }
 0x3fa   : > { %1712 = vmatmul.mubr.msk.bf16.vlgmr.msra.gmra.mrb[8].mxu0 %vm823_vm3, %v881_v45 }
 0x3fb   : > { %1722 = vmatpush3.bf16.msra.mxu0 %v1012_v46  ;;  %1723 = vmatprep.mubr.msk.bf16.mxu0 %vm2221_vm0, %v2220_v0 }
 0x3fc   : > { %1733 = vmatprep.subr.bf16.mxu0 %v2220_v0 }
 0x45f   : > { %v999_v47 = vpop.xlane.xlu0 %998 }
 0x460   : > { %1901 = vrcp.f32 %v999_v47 }
 0x467   : > { %v1129_v48 = vpop.xlane.xlu1 %1128 }
 0x468   : > { %1903 = vrcp.f32 %v1129_v48 }
 0x46a   : > { %v1902_v49 = vpop.eup %1901 }
 0x46b   : > { %v1001_v50 = vmul.f32 %v1902_v49, %v1894_v30  ;;  %v1267_v57 = vpop.permute.xlu1 %1266 }
 0x46c   : > { %v1272_v59 = vsel %vm885_vm4, %v1267_v57, 0 }
 0x46d   : > { %v1002_v51 = vpack.c.bf16 %v1001_v50, %v1001_v50 }
 0x46f   : > { %1724 = vmatmul.mubr.msk.bf16.vlgmr.msra.gmra.mrb[12].mxu0 %vm823_vm3, %v1002_v51  ;;  %v1259_v52 = vpop.xlane.xlu0 %1258 }
 0x470   : > { %1905 = vrcp.f32 %v1259_v52  ;;  %1735 = vmatprep.mubr.msk.bf16.mxu0 %vm2221_vm0, %v2220_v0 }
 0x472   : > { %v1904_v53 = vpop.eup %1903 }
 0x473   : > { %v1131_v54 = vmul.f32 %v1904_v53, %v1896_v35  ;;  %v1137_v55 = vpop.permute.xlu0 %1136 }
 0x474   : > { %v1142_v56 = vsel %vm885_vm4, %v1137_v55, 0 }
 0x475   : > { %1734 = vmatpush3.bf16.msra.mxu0 %v1142_v56  ;;  %v1132_v58 = vpack.c.bf16 %v1131_v54, %v1131_v54 }
 0x476   : > { %1745 = vmatprep.subr.bf16.mxu0 %v2220_v0 }
 0x478   : > { %1736 = vmatmul.mubr.msk.bf16.vlgmr.msra.gmra.mrb[16].mxu0 %vm823_vm3, %v1132_v58 }
 0x479   : > { %1746 = vmatpush3.bf16.msra.mxu0 %v1272_v59  ;;  %1747 = vmatprep.mubr.msk.bf16.mxu0 %vm2221_vm0, %v2220_v0 }
 0x47a   : > { %v1906_v60 = vpop.eup %1905 }
 0x47b   : > { %v1261_v61 = vmul.f32 %v1906_v60, %v1898_v37 }
 0x47d   : > { %v1262_v62 = vpack.c.bf16 %v1261_v61, %v1261_v61 }
 0x480   : > { %1748 = vmatmul.mubr.msk.bf16.vlgmr.msra.gmra.mrb[20].mxu0 %vm823_vm3, %v1262_v62 }
 0x4cd   : > { %v923_v63 = vpop.f32.mrb[8].mxu0 }
 0x4ce   : > { %v929_v1 = vpack.c.bf16 %v923_v63, %v923_v63  ;;  %v1713_v2 = vpop.f32.mrb[9].mxu0 }
 0x4cf   : > { %v926_v3 = vpop.f32.mrb[10].mxu0 }
 0x4d0   : > { %931 = vst.msk [vmem:[#allocation4] sm:$0xf] %vm930_vm5, %v929_v1  ;;  %v1714_v4 = vpop.f32.mrb[11].mxu0 }
 0x542   : > { %v1048_v5 = vpop.f32.mrb[12].mxu0 }
 0x543   : > { %v1648_v6 = vpack.c.bf16 %v1048_v5, %v1048_v5  ;;  %v1725_v7 = vpop.f32.mrb[13].mxu0 }
 0x544   : > { %v1051_v8 = vpop.f32.mrb[14].mxu0 }
 0x545   : > { %1058 = vrot.lane.b32.xlu1 %v1648_v6, %s2225_s4  ;;  %v1726_v9 = vpop.f32.mrb[15].mxu0  ;;  %s1392_s4 = scalar_lea.sflag [#allocation7], %s2608_s24 }
 0x54b   : > { %v1178_v11 = vpop.f32.mrb[16].mxu0 }
 0x54c   : > { %v1649_v13 = vpack.c.bf16 %v1178_v11, %v1178_v11  ;;  %v1737_v14 = vpop.f32.mrb[17].mxu0 }
 0x54d   : > { %v1181_v15 = vpop.f32.mrb[18].mxu0 }
 0x54e   : > { %1188 = vrot.lane.b32.xlu0 %v1649_v13, %s2226_s15  ;;  %v1738_v16 = vpop.f32.mrb[19].mxu0 }
 0x553   : > { %v1308_v17 = vpop.f32.mrb[20].mxu0 }
 0x554   : > { %v1650_v18 = vpack.c.bf16 %v1308_v17, %v1308_v17  ;;  %v1749_v19 = vpop.f32.mrb[21].mxu0 }
 0x555   : > { %v1311_v20 = vpop.f32.mrb[22].mxu0 }
 0x556   : > { %1318 = vrot.lane.b32.xlu1 %v1650_v18, %s2227_s18  ;;  %v1750_v21 = vpop.f32.mrb[23].mxu0 }
 0x5b7   : > { %v1059_v22 = vpop.permute.xlu1 %1058 }
 0x5b8   : > { %1062 = vst.msk [vmem:[#allocation4] sm:$0xf] %vm1061_vm6, %v1059_v22 }
 0x5c0   : > { %v1189_v23 = vpop.permute.xlu0 %1188 }
 0x5c1   : > { %1192 = vst.msk [vmem:[#allocation4] sm:$0xf] %vm1191_vm7, %v1189_v23 }
 0x5c8   : > { %v1319_v0 = vpop.permute.xlu1 %1318 }
 0x5c9   : > { %1322 = vst.msk [vmem:[#allocation4] sm:$0xf] %vm1321_vm8, %v1319_v0 }
 0x5d0   : > { %v1323_v24 = vld [vmem:[#allocation4] sm:$0xf] }
 0x5d1   : > { %1756 = vmatmul.mubr.msk.bf16.vlgmr.msra.gmra.mrb[20].mxu1 %vm633_vm1, %v1323_v24 }
 0x6a4   : > { %v1384_v26 = vpop.f32.mrb[20].mxu1 }
 0x6a5   : > { %v1385_v27 = vadd.f32 %v1639_v25, %v1384_v26  ;;  %v1757_v28 = vpop.f32.mrb[21].mxu1 }
 0x6a6   : > { %v1387_v29 = vpop.f32.mrb[22].mxu1 }
 0x6a7   : > { %v1758_v30 = vpop.f32.mrb[23].mxu1  ;;  %1390 = vst.msk [vmem:[%s600_s12] sm:$0xff] %vm633_vm1, %v1385_v27 }
 0x6a8   : > { %2124 = shalt.err (!%p2121_p7)
}
 0x6a9   : > { %s2125_s24 = scalar_lea.hbm %s2752_s30, 128  ;;  %s2129_s15 = scalar_lea.hbm %s2882_s16, 256 }
 0x6aa   : > { %p2126_p6 = scmp.ne.s32.totalorder %s2752_s30, %s2125_s24  ;;  %p2130_p4 = scmp.lt.u32.totalorder %s2752_s30, %s2882_s16 }
 0x6ab   : > { %p2131_p1 = scmp.lt.u32.totalorder %s2129_s15, %s2125_s24  ;;  %p2133_p13 = scmp.lt.u32.totalorder %s2125_s24, %s2752_s30 }
 0x6ac   : > { %p2127_p11 = pnand %p2126_p6, %p2883_p12 }
 0x6ad   : > { %p2132_p8 = por %p2131_p1, %p2130_p4 }
 0x6ae   : > { %p2128_p2 = pneg %p2127_p11 }
 0x6af   : > { %p2134_p3 = por %p2133_p13, %p2132_p8 }
 0x6b1   : > { %p2135_p0 = pnand %p2134_p3, %p2128_p2 }
 0x6b3   : > { %2138 = shalt.err (!%p2135_p0)
}
 0x6b4   : > { %1779 = dma.vmem_to_hbm [thread:$0]  (%p2883_p12), %s2754_s28, 128, %s2752_s30, %s1392_s4  }
 0x6b5 PF: > { %s2884_s17 = sld [smem:[#allocation24_spill]]  ;;  %s2885_s27 = sld [smem:[#allocation27_spill]] }
 0x6b6   : > { %p2887_p10 = scmp.ge.s32.totalorder %s2209_s26, 2 }
 0x6bb   : > { %s1418_s10 = sand.u32 1, %s2884_s17   ;;  %p2886_p9 = scmp.ne.s32.totalorder %s2885_s27, 0 }
 0x6bc   : > { %s1419_s8 = scalar_lea.sflag [#allocation7], %s1418_s10 }
 0x6bd   : > { %p1805_p5 = pnand %p2887_p10, %p2886_p9 }
 0x6bf   : > { %2184 = dma.done.wait (!%p1805_p5), %s1419_s8, 128  }
 0x6c0   : > { %2186 = vsyncadd (!%p1805_p5), %s1419_s8, 4294967168  ;;  %s35_s26 = sadd.s32 1, %s2209_s26   ;;  %s2888_s12 = sld [smem:[#allocation25_spill]] }
 0x6c1   : > { %p32_p7 = scmp.ge.s32.totalorder %s35_s26, 4   ;;  %s2889_s23 = sld [smem:[#allocation30_spill]] }
 0x6c2   : > { %s2890_s5 = sld [smem:[#allocation28_spill]]  ;;  %s2891_s21 = smov %s2193_s22 }
 0x6c3   : > { %s2893_s24 = smov %s2205_s25  ;;  %34 = sbr.rel (!%p32_p7) target bundleno = 20 (0x14), region = 169 }
 0x6c6   : > { %s2892_s22 = smov %s2888_s12 }
 0x6c8   : > { %s2894_s25 = smov %s2890_s5 }
 0x6ca   :  { %1424 = vsyncpa [#allocation6], 1 }
 0x6cb   :  { %1426 = vsyncpa [#allocation6 + $0x1], 1 }
 0x6cc   :  { %1427 = vsyncpa [#allocation9], 1 }
 0x6cd   :  { %1429 = vsyncpa [#allocation9 + $0x1], 1 }
 0x6ce   :  { %1430 = vsyncpa [#allocation12], 1 }
 0x6cf   :  { %1432 = vsyncpa [#allocation12 + $0x1], 1 }
 0x6d0   :  { %1433 = vsyncpa [#allocation15], 1 }
 0x6d1   :  { %1434 = vsyncpa [#allocation7], 1 }
 0x6d2   :  { %1436 = vsyncpa [#allocation7 + $0x1], 1 }

</bundles_post_ra>
